<compile_context>
chip_gen: v6e
topology: v6e:2x2x1
jax: 0.10.0
libtpu: 0.0.40
codegen_flags: <defaults>
</compile_context>

<pallas_src>
import jax
import jax.numpy as jnp
from jax import lax
from jax.experimental import pallas as pl
from jax.experimental.pallas import tpu as pltpu

VPAD = 640        # vision feature dim padded 576 -> 5*128 (lane-dense)
OUTW = 128        # packed head output width (stage 0:3 | days 3 | attn 4:6)
VIS = 576         # logical vision feature dim (MobileNetV3-Small)
TM_MAX = 1024     # large row block (per perf review; per-step overhead-bound)


def _round_up(x, m):
    return (x + m - 1) // m * m


def _hardswish(x):
    return x * jnp.clip(x + 3.0, 0.0, 6.0) * (1.0 / 6.0)


def _relu(x):
    return jnp.maximum(x, 0.0)


def _bf16_elementwise_ok():
    # bf16 VALU exists on v6e / v7x; v5e (and older) would emulate bf16
    # elementwise math in f32, so keep f32 there.
    try:
        kind = jax.devices()[0].device_kind.lower()
        return ("v6" in kind) or ("v7" in kind)
    except Exception:
        return False


_BF16_ELEM = _bf16_elementwise_ok()


# ---------------------------------------------------------------------------
# fused kernel: vision stem/proj over row blocks + head epilogue on last step
# ---------------------------------------------------------------------------
def _make_kernel(P, TM, BPg, bf16_elem):
    inv_p = 1.0 / float(P)

    def kernel(patches_ref, meta_ref,
               stem_w, stem_b, proj_w, proj_b,
               mw1, mb1, mw2, mb2,
               aw1v, aw1m, ab1, aw2, ab2,
               fw1v, fw1m, fb1, fw2, fb2,
               head_w, head_b, attn_sel,
               out_ref, acc_ref):
        i = pl.program_id(1)

        @pl.when(i == 0)
        def _():
            acc_ref[...] = jnp.zeros_like(acc_ref)

        # ---- vision stem + 1x1 proj on a (TM, K*K*C) row block (bf16 MXU) --
        p = patches_ref[...]                                         # bf16
        h = jnp.dot(p, stem_w[...],
                    preferred_element_type=jnp.float32) + stem_b[...]
        h = _hardswish(h)                                            # f32 (TM,16)
        h2f = jnp.dot(h.astype(jnp.bfloat16), proj_w[...],
                      preferred_element_type=jnp.float32) + proj_b[...]
        if bf16_elem:
            # v6e / v7x: bf16 VALU -> halve VPU work + footprint of the
            # largest intermediate (TM, VPAD).
            h2 = _hardswish(h2f.astype(jnp.bfloat16))                # bf16
        else:
            # v5e: no bf16 VPU; hardswish in f32, downcast once for the MXU.
            h2 = _hardswish(h2f).astype(jnp.bfloat16)                # bf16

        # per-sample sum (global avgpool) via a one-hot segment matmul.
        # Divide-free window compare: row r belongs to local sample s iff
        # s*P <= r < (s+1)*P; rows past BPg*P match no sample (dropped).
        samp = lax.broadcasted_iota(jnp.int32, (BPg, 1), 0)
        col = lax.broadcasted_iota(jnp.int32, (1, TM), 1)
        grow = i * TM + col
        lo = samp * P
        onehot = jnp.logical_and(grow >= lo, grow < lo + P).astype(jnp.bfloat16)
        acc_ref[...] += jnp.dot(onehot, h2,
                                preferred_element_type=jnp.float32)

        # ---- fused multimodal head (epilogue, last row block only) ---------
        @pl.when(i == pl.num_programs(1) - 1)
        def _():
            vis = acc_ref[...] * inv_p                               # mean pool
            vis_b = vis.astype(jnp.bfloat16)
            meta = meta_ref[...]

            # metadata_encoder (Dropout = identity in eval)
            m1 = _relu(jnp.dot(meta.astype(jnp.bfloat16), mw1[...],
                               preferred_element_type=jnp.float32) + mb1[...])
            m2 = _relu(jnp.dot(m1.astype(jnp.bfloat16), mw2[...],
                               preferred_element_type=jnp.float32) + mb2[...])
            m2_b = m2.astype(jnp.bfloat16)

            # attention over combined = [vision | metadata] (weights pre-split)
            a1 = _relu(jnp.dot(vis_b, aw1v[...],
                               preferred_element_type=jnp.float32)
                       + jnp.dot(m2_b, aw1m[...],
                                 preferred_element_type=jnp.float32)
                       + ab1[...])
            logits = jnp.dot(a1.astype(jnp.bfloat16), aw2[...],
                             preferred_element_type=jnp.float32) + ab2[...]
            logits = logits - jnp.max(logits, axis=1, keepdims=True)
            e = jnp.exp(logits)
            # exact division: attn is a user-visible output; tiny epilogue cost
            attn = e / jnp.sum(e, axis=1, keepdims=True)             # (BPg, 2)

            wv = (vis * attn[:, 0:1]).astype(jnp.bfloat16)
            wm = (m2 * attn[:, 1:2]).astype(jnp.bfloat16)

            # fusion_layer
            f1 = _relu(jnp.dot(wv, fw1v[...],
                               preferred_element_type=jnp.float32)
                       + jnp.dot(wm, fw1m[...],
                                 preferred_element_type=jnp.float32)
                       + fb1[...])
            f2 = _relu(jnp.dot(f1.astype(jnp.bfloat16), fw2[...],
                               preferred_element_type=jnp.float32) + fb2[...])

            # packed lane-dense output: stage in 0:3, days in 3, attn in 4:6
            packed = jnp.dot(f2.astype(jnp.bfloat16), head_w[...],
                             preferred_element_type=jnp.float32) + head_b[...]
            sel = attn_sel[...]
            packed = packed + attn[:, 0:1] * sel[0:1, :] + attn[:, 1:2] * sel[1:2, :]
            out_ref[...] = packed

    return kernel


# ---------------------------------------------------------------------------
# wrapper
# ---------------------------------------------------------------------------
@jax.jit
def forward(image, metadata, kp):
    B, C, H, W = image.shape
    Ho, Wo = H // 2, W // 2
    P = Ho * Wo
    KC = 9 * C
    MD = metadata.shape[1]

    # im2col (3x3, stride 2, pad 1); feature order (ky, kx, c).
    # TODO(synk): for real image resolutions move im2col into the kernel
    # (9 shifted accumulating matmuls on an NHWC tile) to avoid the ~9x HBM
    # round-trip of the patches matrix (matters most on v5e's HBM bandwidth).
    x = jnp.transpose(image, (0, 2, 3, 1))
    x = jnp.pad(x, ((0, 0), (1, 1), (1, 1), (0, 0)))
    cols = [x[:, dy:dy + 2 * Ho:2, dx:dx + 2 * Wo:2, :]
            for dy in range(3) for dx in range(3)]
    patches = jnp.concatenate(cols, axis=-1).reshape(B, P, KC).astype(jnp.bfloat16)

    # Split the batch into G contiguous groups -> leading "parallel" grid axis
    # (sharded across the 2 TensorCores on v7x; a no-op on v5e/v6e).
    G = 2 if B >= 2 else 1
    Bg = -(-B // G)                        # samples per group (ceil)
    BPg = _round_up(Bg, 8)
    Bpad = G * Bg
    meta = metadata.astype(jnp.float32)
    if Bpad > B:
        patches = jnp.pad(patches, ((0, Bpad - B), (0, 0), (0, 0)))
        meta = jnp.pad(meta, ((0, Bpad - B), (0, 0)))

    Mg = Bg * P
    TM = min(TM_MAX, _round_up(Mg, 8))
    Mgp = _round_up(Mg, TM)
    patches = patches.reshape(G, Mg, KC)
    if Mgp > Mg:
        patches = jnp.pad(patches, ((0, 0), (0, Mgp - Mg), (0, 0)))
    meta = meta.reshape(G, Bg, MD)
    if BPg > Bg:
        meta = jnp.pad(meta, ((0, 0), (0, BPg - Bg), (0, 0)))

    def full(a):
        n = a.ndim
        return pl.BlockSpec(a.shape, lambda g, i, n=n: (0,) * n)

    weights = (
        kp["stem_w"], kp["stem_b"], kp["proj_w"], kp["proj_b"],
        kp["meta_w1"], kp["meta_b1"], kp["meta_w2"], kp["meta_b2"],
        kp["attn_w1_v"], kp["attn_w1_m"], kp["attn_b1"], kp["attn_w2"], kp["attn_b2"],
        kp["fus_w1_v"], kp["fus_w1_m"], kp["fus_b1"], kp["fus_w2"], kp["fus_b2"],
        kp["head_w"], kp["head_b"], kp["attn_sel"],
    )

    out = pl.pallas_call(
        _make_kernel(P, TM, BPg, _BF16_ELEM),
        out_shape=jax.ShapeDtypeStruct((G, BPg, OUTW), jnp.float32),
        grid=(G, Mgp // TM),
        in_specs=[pl.BlockSpec((None, TM, KC), lambda g, i: (g, i, 0)),
                  pl.BlockSpec((None, BPg, MD), lambda g, i: (g, 0, 0))]
                 + [full(w) for w in weights],
        out_specs=pl.BlockSpec((None, BPg, OUTW), lambda g, i: (g, 0, 0)),
        scratch_shapes=[pltpu.VMEM((BPg, VPAD), jnp.float32)],
        compiler_params=pltpu.CompilerParams(
            dimension_semantics=("parallel", "arbitrary"),
            vmem_limit_bytes=32 * 1024 * 1024),
    )(patches, meta, *weights)

    rows = out[:, :Bg, :].reshape(G * Bg, OUTW)[:B]
    stage_pred = rows[:, 0:3]
    days_pred = rows[:, 3:4]
    attn_w = rows[:, 4:6]
    return stage_pred, days_pred, attn_w


# ---------------------------------------------------------------------------
# parameters: logical (PyTorch-shaped) init + packing for the kernel
# ---------------------------------------------------------------------------
def init_params(key):
    def dense(k, shape, scale=0.08):
        return jax.random.normal(k, shape, jnp.float32) * scale

    ks = jax.random.split(key, 20)
    p = {}
    # vision stub
    p["stem_w"] = dense(ks[0], (27, 16));     p["stem_b"] = dense(ks[1], (16,), 0.05)
    p["proj_w"] = dense(ks[2], (16, VIS));    p["proj_b"] = dense(ks[3], (VIS,), 0.05)
    # metadata encoder
    p["meta_w1"] = dense(ks[4], (4, 32));     p["meta_b1"] = dense(ks[5], (32,), 0.05)
    p["meta_w2"] = dense(ks[6], (32, 64));    p["meta_b2"] = dense(ks[7], (64,), 0.05)
    # attention: Linear(640 = 576 + 64, 64) then Linear(64, 2)
    p["attn_w1"] = dense(ks[8], (VIS + 64, 64)); p["attn_b1"] = dense(ks[9], (64,), 0.05)
    p["attn_w2"] = dense(ks[10], (64, 2));    p["attn_b2"] = dense(ks[11], (2,), 0.05)
    # fusion: Linear(640, 256) then Linear(256, 128)
    p["fus_w1"] = dense(ks[12], (VIS + 64, 256)); p["fus_b1"] = dense(ks[13], (256,), 0.05)
    p["fus_w2"] = dense(ks[14], (256, 128));  p["fus_b2"] = dense(ks[15], (128,), 0.05)
    # heads
    p["stage_w"] = dense(ks[16], (128, 3));   p["stage_b"] = dense(ks[17], (3,), 0.05)
    p["days_w"] = dense(ks[18], (128, 1));    p["days_b"] = dense(ks[19], (1,), 0.05)
    return p


def pack_params(p):
    bf, f32 = jnp.bfloat16, jnp.float32
    kp = {}
    kp["stem_w"] = p["stem_w"].astype(bf)
    kp["stem_b"] = p["stem_b"].reshape(1, -1).astype(f32)
    # pad vision channel dim 576 -> 640 (zeros => padded features stay 0)
    kp["proj_w"] = jnp.pad(p["proj_w"], ((0, 0), (0, VPAD - VIS))).astype(bf)
    kp["proj_b"] = jnp.pad(p["proj_b"], ((0, VPAD - VIS),)).reshape(1, -1).astype(f32)
    kp["meta_w1"] = p["meta_w1"].astype(bf)
    kp["meta_b1"] = p["meta_b1"].reshape(1, -1).astype(f32)
    kp["meta_w2"] = p["meta_w2"].astype(bf)
    kp["meta_b2"] = p["meta_b2"].reshape(1, -1).astype(f32)
    # split the concat([vision, meta]) weights; pad vision rows to 640
    kp["attn_w1_v"] = jnp.pad(p["attn_w1"][:VIS], ((0, VPAD - VIS), (0, 0))).astype(bf)
    kp["attn_w1_m"] = p["attn_w1"][VIS:].astype(bf)
    kp["attn_b1"] = p["attn_b1"].reshape(1, -1).astype(f32)
    kp["attn_w2"] = p["attn_w2"].astype(bf)
    kp["attn_b2"] = p["attn_b2"].reshape(1, -1).astype(f32)
    kp["fus_w1_v"] = jnp.pad(p["fus_w1"][:VIS], ((0, VPAD - VIS), (0, 0))).astype(bf)
    kp["fus_w1_m"] = p["fus_w1"][VIS:].astype(bf)
    kp["fus_b1"] = p["fus_b1"].reshape(1, -1).astype(f32)
    kp["fus_w2"] = p["fus_w2"].astype(bf)
    kp["fus_b2"] = p["fus_b2"].reshape(1, -1).astype(f32)
    # packed lane-dense head: cols 0..2 stage, col 3 days; attn routed to 4..5
    head_w = jnp.zeros((128, OUTW), f32)
    head_w = head_w.at[:, 0:3].set(p["stage_w"]).at[:, 3:4].set(p["days_w"])
    head_b = jnp.zeros((1, OUTW), f32)
    head_b = head_b.at[0, 0:3].set(p["stage_b"]).at[0, 3].set(p["days_b"][0])
    kp["head_w"] = head_w.astype(bf)
    kp["head_b"] = head_b
    kp["attn_sel"] = jnp.zeros((2, OUTW), f32).at[0, 4].set(1.0).at[1, 5].set(1.0)
    return kp


# ---------------------------------------------------------------------------
# pure-JAX f32 reference (same math, un-split / un-padded weights)
# ---------------------------------------------------------------------------
def reference_forward(image, metadata, p):
    B, C, H, W = image.shape
    Ho, Wo = H // 2, W // 2
    P = Ho * Wo
    x = jnp.transpose(image, (0, 2, 3, 1))
    x = jnp.pad(x, ((0, 0), (1, 1), (1, 1), (0, 0)))
    cols = [x[:, dy:dy + 2 * Ho:2, dx:dx + 2 * Wo:2, :]
            for dy in range(3) for dx in range(3)]
    patches = jnp.concatenate(cols, axis=-1).reshape(B, P, 9 * C)
    h = _hardswish(patches @ p["stem_w"] + p["stem_b"])
    h2 = _hardswish(h @ p["proj_w"] + p["proj_b"])
    vis = jnp.mean(h2, axis=1)
    m = _relu(metadata @ p["meta_w1"] + p["meta_b1"])
    m = _relu(m @ p["meta_w2"] + p["meta_b2"])
    comb = jnp.concatenate([vis, m], axis=1)
    attn = jax.nn.softmax(
        _relu(comb @ p["attn_w1"] + p["attn_b1"]) @ p["attn_w2"] + p["attn_b2"],
        axis=1)
    wv, wm = vis * attn[:, 0:1], m * attn[:, 1:2]
    f = _relu(jnp.concatenate([wv, wm], axis=1) @ p["fus_w1"] + p["fus_b1"])
    f = _relu(f @ p["fus_w2"] + p["fus_b2"])
    return (f @ p["stage_w"] + p["stage_b"],
            f @ p["days_w"] + p["days_b"], attn)


if __name__ == "__main__":
    key = jax.random.PRNGKey(0)
    k_img, k_meta, k_params = jax.random.split(key, 3)

    B = 2
    image = jax.random.normal(k_img, (B, 3, 16, 16), jnp.float32)   # NCHW
    metadata = jax.random.normal(k_meta, (B, 4), jnp.float32)
    params = init_params(k_params)
    kparams = pack_params(params)

    stage_pred, days_pred, attn_w = jax.block_until_ready(
        forward(image, metadata, kparams))

    assert stage_pred.shape == (B, 3)
    assert days_pred.shape == (B, 1)
    assert attn_w.shape == (B, 2)
    assert bool(jnp.all(jnp.isfinite(stage_pred)))
    assert bool(jnp.all(jnp.isfinite(days_pred)))
    assert bool(jnp.all(jnp.isfinite(attn_w)))

    ref_stage, ref_days, ref_attn = reference_forward(image, metadata, params)
    assert jnp.allclose(stage_pred, ref_stage, atol=1e-2, rtol=1e-2)
    assert jnp.allclose(days_pred, ref_days, atol=1e-2, rtol=1e-2)
    assert jnp.allclose(attn_w, ref_attn, atol=1e-2, rtol=1e-2)

    print("KERNEL_OK")
</pallas_src>

<mosaic_0001>
module attributes {stable_mosaic.version = 11 : i64} {
  func.func @kernel(%arg0: i32, %arg1: i32, %arg2: memref<1x64x27xbf16, #tpu.memory_space<vmem>>, %arg3: memref<1x8x4xf32, #tpu.memory_space<vmem>>, %arg4: memref<27x16xbf16, #tpu.memory_space<vmem>>, %arg5: memref<1x16xf32, #tpu.memory_space<vmem>>, %arg6: memref<16x640xbf16, #tpu.memory_space<vmem>>, %arg7: memref<1x640xf32, #tpu.memory_space<vmem>>, %arg8: memref<4x32xbf16, #tpu.memory_space<vmem>>, %arg9: memref<1x32xf32, #tpu.memory_space<vmem>>, %arg10: memref<32x64xbf16, #tpu.memory_space<vmem>>, %arg11: memref<1x64xf32, #tpu.memory_space<vmem>>, %arg12: memref<640x64xbf16, #tpu.memory_space<vmem>>, %arg13: memref<64x64xbf16, #tpu.memory_space<vmem>>, %arg14: memref<1x64xf32, #tpu.memory_space<vmem>>, %arg15: memref<64x2xbf16, #tpu.memory_space<vmem>>, %arg16: memref<1x2xf32, #tpu.memory_space<vmem>>, %arg17: memref<640x256xbf16, #tpu.memory_space<vmem>>, %arg18: memref<64x256xbf16, #tpu.memory_space<vmem>>, %arg19: memref<1x256xf32, #tpu.memory_space<vmem>>, %arg20: memref<256x128xbf16, #tpu.memory_space<vmem>>, %arg21: memref<1x128xf32, #tpu.memory_space<vmem>>, %arg22: memref<128x128xbf16, #tpu.memory_space<vmem>>, %arg23: memref<1x128xf32, #tpu.memory_space<vmem>>, %arg24: memref<2x128xf32, #tpu.memory_space<vmem>>, %arg25: memref<1x8x128xf32, #tpu.memory_space<vmem>>, %arg26: memref<8x640xf32, #tpu.memory_space<vmem>>) attributes {dimension_semantics = [#tpu.dimension_semantics<parallel>, #tpu.dimension_semantics<arbitrary>], iteration_bounds = array<i64: 2, 1>, scalar_prefetch = 0 : i64, scratch_operands = 1 : i64, tpu.core_type = #tpu.core_type<tc>, window_params = [{transform_indices = @transform_0, window_bounds = array<i64: 1, 64, 27>}, {transform_indices = @transform_1, window_bounds = array<i64: 1, 8, 4>}, {pipeline_mode = #tpu.pipeline_mode<synchronous>, transform_indices = @transform_2, window_bounds = array<i64: 27, 16>}, {pipeline_mode = #tpu.pipeline_mode<synchronous>, transform_indices = @transform_3, window_bounds = array<i64: 1, 16>}, {pipeline_mode = #tpu.pipeline_mode<synchronous>, transform_indices = @transform_4, window_bounds = array<i64: 16, 640>}, {pipeline_mode = #tpu.pipeline_mode<synchronous>, transform_indices = @transform_5, window_bounds = array<i64: 1, 640>}, {pipeline_mode = #tpu.pipeline_mode<synchronous>, transform_indices = @transform_6, window_bounds = array<i64: 4, 32>}, {pipeline_mode = #tpu.pipeline_mode<synchronous>, transform_indices = @transform_7, window_bounds = array<i64: 1, 32>}, {pipeline_mode = #tpu.pipeline_mode<synchronous>, transform_indices = @transform_8, window_bounds = array<i64: 32, 64>}, {pipeline_mode = #tpu.pipeline_mode<synchronous>, transform_indices = @transform_9, window_bounds = array<i64: 1, 64>}, {pipeline_mode = #tpu.pipeline_mode<synchronous>, transform_indices = @transform_10, window_bounds = array<i64: 640, 64>}, {pipeline_mode = #tpu.pipeline_mode<synchronous>, transform_indices = @transform_11, window_bounds = array<i64: 64, 64>}, {pipeline_mode = #tpu.pipeline_mode<synchronous>, transform_indices = @transform_12, window_bounds = array<i64: 1, 64>}, {pipeline_mode = #tpu.pipeline_mode<synchronous>, transform_indices = @transform_13, window_bounds = array<i64: 64, 2>}, {pipeline_mode = #tpu.pipeline_mode<synchronous>, transform_indices = @transform_14, window_bounds = array<i64: 1, 2>}, {pipeline_mode = #tpu.pipeline_mode<synchronous>, transform_indices = @transform_15, window_bounds = array<i64: 640, 256>}, {pipeline_mode = #tpu.pipeline_mode<synchronous>, transform_indices = @transform_16, window_bounds = array<i64: 64, 256>}, {pipeline_mode = #tpu.pipeline_mode<synchronous>, transform_indices = @transform_17, window_bounds = array<i64: 1, 256>}, {pipeline_mode = #tpu.pipeline_mode<synchronous>, transform_indices = @transform_18, window_bounds = array<i64: 256, 128>}, {pipeline_mode = #tpu.pipeline_mode<synchronous>, transform_indices = @transform_19, window_bounds = array<i64: 1, 128>}, {pipeline_mode = #tpu.pipeline_mode<synchronous>, transform_indices = @transform_20, window_bounds = array<i64: 128, 128>}, {pipeline_mode = #tpu.pipeline_mode<synchronous>, transform_indices = @transform_21, window_bounds = array<i64: 1, 128>}, {pipeline_mode = #tpu.pipeline_mode<synchronous>, transform_indices = @transform_22, window_bounds = array<i64: 2, 128>}, {transform_indices = @transform_23, window_bounds = array<i64: 1, 8, 128>}]} {
    %c0_i32 = arith.constant 0 : i32
    %0 = arith.cmpi eq, %arg1, %c0_i32 : i32
    %1 = arith.extui %0 : i1 to i32
    %c0_i32_0 = arith.constant 0 : i32
    %2 = arith.cmpi ne, %1, %c0_i32_0 : i32
    scf.if %2 {
      %cst_29 = arith.constant 0.000000e+00 : f32
      %61 = vector.broadcast %cst_29 : f32 to vector<8x640xf32>
      %c0_30 = arith.constant 0 : index
      %c0_31 = arith.constant 0 : index
      %62 = vector.load %arg26[%c0_30, %c0_31] : memref<8x640xf32, #tpu.memory_space<vmem>>, vector<8x640xf32>
      tpu.vector_store %arg26[%c0_30, %c0_31], %61 {strides = array<i32>} : memref<8x640xf32, #tpu.memory_space<vmem>>, vector<8x640xf32>,
    } else {
    }
    %c0 = arith.constant 0 : index
    %c0_1 = arith.constant 0 : index
    %c0_2 = arith.constant 0 : index
    %3 = vector.load %arg2[%c0, %c0_1, %c0_2] : memref<1x64x27xbf16, #tpu.memory_space<vmem>>, vector<1x64x27xbf16>
    %4 = vector.shape_cast %3 : vector<1x64x27xbf16> to vector<64x27xbf16>
    %c0_3 = arith.constant 0 : index
    %c0_4 = arith.constant 0 : index
    %5 = vector.load %arg4[%c0_3, %c0_4] : memref<27x16xbf16, #tpu.memory_space<vmem>>, vector<27x16xbf16>
    %cst = arith.constant dense<0.000000e+00> : vector<64x16xf32>
    %6 = tpu.matmul %4, %5, %cst {dimension_numbers = #tpu.dot_dimension_numbers<[1], [0], [0], [1], [0, 0, 1, 1], [], []>} : vector<64x27xbf16>, vector<27x16xbf16>, vector<64x16xf32> -> vector<64x16xf32>
    %c0_5 = arith.constant 0 : index
    %c0_6 = arith.constant 0 : index
    %7 = vector.load %arg5[%c0_5, %c0_6] : memref<1x16xf32, #tpu.memory_space<vmem>>, vector<1x16xf32>
    %8 = vector.broadcast %7 : vector<1x16xf32> to vector<64x16xf32>
    %9 = arith.addf %6, %8 : vector<64x16xf32>
    %cst_7 = arith.constant 3.000000e+00 : f32
    %10 = vector.broadcast %cst_7 : f32 to vector<64x16xf32>
    %11 = arith.addf %9, %10 : vector<64x16xf32>
    %cst_8 = arith.constant 0.000000e+00 : f32
    %cst_9 = arith.constant 6.000000e+00 : f32
    %12 = vector.broadcast %cst_8 : f32 to vector<64x16xf32>
    %13 = arith.maximumf %12, %11 : vector<64x16xf32>
    %14 = vector.broadcast %cst_9 : f32 to vector<64x16xf32>
    %15 = arith.minimumf %14, %13 : vector<64x16xf32>
    %16 = arith.mulf %9, %15 : vector<64x16xf32>
    %cst_10 = arith.constant 0.166666672 : f32
    %17 = vector.broadcast %cst_10 : f32 to vector<64x16xf32>
    %18 = arith.mulf %16, %17 : vector<64x16xf32>
    %19 = arith.truncf %18 : vector<64x16xf32> to vector<64x16xbf16>
    %c0_11 = arith.constant 0 : index
    %c0_12 = arith.constant 0 : index
    %20 = vector.load %arg6[%c0_11, %c0_12] : memref<16x640xbf16, #tpu.memory_space<vmem>>, vector<16x640xbf16>
    %cst_13 = arith.constant dense<0.000000e+00> : vector<64x640xf32>
    %21 = tpu.matmul %19, %20, %cst_13 {dimension_numbers = #tpu.dot_dimension_numbers<[1], [0], [0], [1], [0, 0, 1, 1], [], []>} : vector<64x16xbf16>, vector<16x640xbf16>, vector<64x640xf32> -> vector<64x640xf32>
    %c0_14 = arith.constant 0 : index
    %c0_15 = arith.constant 0 : index
    %22 = vector.load %arg7[%c0_14, %c0_15] : memref<1x640xf32, #tpu.memory_space<vmem>>, vector<1x640xf32>
    %23 = vector.broadcast %22 : vector<1x640xf32> to vector<64x640xf32>
    %24 = arith.addf %21, %23 : vector<64x640xf32>
    %cst_16 = arith.constant 3.000000e+00 : f32
    %25 = vector.broadcast %cst_16 : f32 to vector<64x640xf32>
    %26 = arith.addf %24, %25 : vector<64x640xf32>
    %cst_17 = arith.constant 0.000000e+00 : f32
    %cst_18 = arith.constant 6.000000e+00 : f32
    %27 = vector.broadcast %cst_17 : f32 to vector<64x640xf32>
    %28 = arith.maximumf %27, %26 : vector<64x640xf32>
    %29 = vector.broadcast %cst_18 : f32 to vector<64x640xf32>
    %30 = arith.minimumf %29, %28 : vector<64x640xf32>
    %31 = arith.mulf %24, %30 : vector<64x640xf32>
    %cst_19 = arith.constant 0.166666672 : f32
    %32 = vector.broadcast %cst_19 : f32 to vector<64x640xf32>
    %33 = arith.mulf %31, %32 : vector<64x640xf32>
    %34 = arith.truncf %33 : vector<64x640xf32> to vector<64x640xbf16>
    %35 = tpu.iota {dimensions = array<i32: 0>} : vector<8x1xi32>
    %36 = tpu.iota {dimensions = array<i32: 1>} : vector<1x64xi32>
    %c64_i32 = arith.constant 64 : i32
    %37 = arith.muli %arg1, %c64_i32 : i32
    %38 = vector.broadcast %37 : i32 to vector<1x64xi32>
    %39 = arith.addi %38, %36 : vector<1x64xi32>
    %c64_i32_20 = arith.constant 64 : i32
    %40 = vector.broadcast %c64_i32_20 : i32 to vector<8x1xi32>
    %41 = arith.muli %35, %40 : vector<8x1xi32>
    %42 = vector.broadcast %39 : vector<1x64xi32> to vector<8x64xi32>
    %43 = vector.broadcast %41 : vector<8x1xi32> to vector<8x64xi32>
    %44 = arith.cmpi sge, %42, %43 : vector<8x64xi32>
    %c64_i32_21 = arith.constant 64 : i32
    %45 = vector.broadcast %c64_i32_21 : i32 to vector<8x1xi32>
    %46 = arith.addi %41, %45 : vector<8x1xi32>
    %47 = vector.broadcast %39 : vector<1x64xi32> to vector<8x64xi32>
    %48 = vector.broadcast %46 : vector<8x1xi32> to vector<8x64xi32>
    %49 = arith.cmpi slt, %47, %48 : vector<8x64xi32>
    %50 = arith.andi %44, %49 : vector<8x64xi1>
    %51 = arith.extui %50 : vector<8x64xi1> to vector<8x64xi32>
    %52 = arith.sitofp %51 : vector<8x64xi32> to vector<8x64xf32>
    %53 = arith.truncf %52 : vector<8x64xf32> to vector<8x64xbf16>
    %c0_22 = arith.constant 0 : index
    %c0_23 = arith.constant 0 : index
    %54 = vector.load %arg26[%c0_22, %c0_23] : memref<8x640xf32, #tpu.memory_space<vmem>>, vector<8x640xf32>
    %cst_24 = arith.constant dense<0.000000e+00> : vector<8x640xf32>
    %55 = tpu.matmul %53, %34, %cst_24 {dimension_numbers = #tpu.dot_dimension_numbers<[1], [0], [0], [1], [0, 0, 1, 1], [], []>} : vector<8x64xbf16>, vector<64x640xbf16>, vector<8x640xf32> -> vector<8x640xf32>
    %56 = arith.addf %54, %55 : vector<8x640xf32>
    %c0_25 = arith.constant 0 : index
    %c0_26 = arith.constant 0 : index
    %57 = vector.load %arg26[%c0_25, %c0_26] : memref<8x640xf32, #tpu.memory_space<vmem>>, vector<8x640xf32>
    tpu.vector_store %arg26[%c0_25, %c0_26], %56 {strides = array<i32>} : memref<8x640xf32, #tpu.memory_space<vmem>>, vector<8x640xf32>,
    %c0_i32_27 = arith.constant 0 : i32
    %58 = arith.cmpi eq, %arg1, %c0_i32_27 : i32
    %59 = arith.extui %58 : i1 to i32
    %c0_i32_28 = arith.constant 0 : i32
    %60 = arith.cmpi ne, %59, %c0_i32_28 : i32
    scf.if %60 {
      %c0_29 = arith.constant 0 : index
      %c0_30 = arith.constant 0 : index
      %61 = vector.load %arg26[%c0_29, %c0_30] : memref<8x640xf32, #tpu.memory_space<vmem>>, vector<8x640xf32>
      %cst_31 = arith.constant 1.562500e-02 : f32
      %62 = vector.broadcast %cst_31 : f32 to vector<8x640xf32>
      %63 = arith.mulf %61, %62 : vector<8x640xf32>
      %64 = arith.truncf %63 : vector<8x640xf32> to vector<8x640xbf16>
      %c0_32 = arith.constant 0 : index
      %c0_33 = arith.constant 0 : index
      %c0_34 = arith.constant 0 : index
      %65 = vector.load %arg3[%c0_32, %c0_33, %c0_34] : memref<1x8x4xf32, #tpu.memory_space<vmem>>, vector<1x8x4xf32>
      %66 = vector.shape_cast %65 : vector<1x8x4xf32> to vector<8x4xf32>
      %67 = arith.truncf %66 : vector<8x4xf32> to vector<8x4xbf16>
      %c0_35 = arith.constant 0 : index
      %c0_36 = arith.constant 0 : index
      %68 = vector.load %arg8[%c0_35, %c0_36] : memref<4x32xbf16, #tpu.memory_space<vmem>>, vector<4x32xbf16>
      %cst_37 = arith.constant dense<0.000000e+00> : vector<8x32xf32>
      %69 = tpu.matmul %67, %68, %cst_37 {dimension_numbers = #tpu.dot_dimension_numbers<[1], [0], [0], [1], [0, 0, 1, 1], [], []>} : vector<8x4xbf16>, vector<4x32xbf16>, vector<8x32xf32> -> vector<8x32xf32>
      %c0_38 = arith.constant 0 : index
      %c0_39 = arith.constant 0 : index
      %70 = vector.load %arg9[%c0_38, %c0_39] : memref<1x32xf32, #tpu.memory_space<vmem>>, vector<1x32xf32>
      %71 = vector.broadcast %70 : vector<1x32xf32> to vector<8x32xf32>
      %72 = arith.addf %69, %71 : vector<8x32xf32>
      %cst_40 = arith.constant 0.000000e+00 : f32
      %73 = vector.broadcast %cst_40 : f32 to vector<8x32xf32>
      %74 = arith.maximumf %72, %73 : vector<8x32xf32>
      %75 = arith.truncf %74 : vector<8x32xf32> to vector<8x32xbf16>
      %c0_41 = arith.constant 0 : index
      %c0_42 = arith.constant 0 : index
      %76 = vector.load %arg10[%c0_41, %c0_42] : memref<32x64xbf16, #tpu.memory_space<vmem>>, vector<32x64xbf16>
      %cst_43 = arith.constant dense<0.000000e+00> : vector<8x64xf32>
      %77 = tpu.matmul %75, %76, %cst_43 {dimension_numbers = #tpu.dot_dimension_numbers<[1], [0], [0], [1], [0, 0, 1, 1], [], []>} : vector<8x32xbf16>, vector<32x64xbf16>, vector<8x64xf32> -> vector<8x64xf32>
      %c0_44 = arith.constant 0 : index
      %c0_45 = arith.constant 0 : index
      %78 = vector.load %arg11[%c0_44, %c0_45] : memref<1x64xf32, #tpu.memory_space<vmem>>, vector<1x64xf32>
      %79 = vector.broadcast %78 : vector<1x64xf32> to vector<8x64xf32>
      %80 = arith.addf %77, %79 : vector<8x64xf32>
      %cst_46 = arith.constant 0.000000e+00 : f32
      %81 = vector.broadcast %cst_46 : f32 to vector<8x64xf32>
      %82 = arith.maximumf %80, %81 : vector<8x64xf32>
      %83 = arith.truncf %82 : vector<8x64xf32> to vector<8x64xbf16>
      %c0_47 = arith.constant 0 : index
      %c0_48 = arith.constant 0 : index
      %84 = vector.load %arg12[%c0_47, %c0_48] : memref<640x64xbf16, #tpu.memory_space<vmem>>, vector<640x64xbf16>
      %cst_49 = arith.constant dense<0.000000e+00> : vector<8x64xf32>
      %85 = tpu.matmul %64, %84, %cst_49 {dimension_numbers = #tpu.dot_dimension_numbers<[1], [0], [0], [1], [0, 0, 1, 1], [], []>} : vector<8x640xbf16>, vector<640x64xbf16>, vector<8x64xf32> -> vector<8x64xf32>
      %c0_50 = arith.constant 0 : index
      %c0_51 = arith.constant 0 : index
      %86 = vector.load %arg13[%c0_50, %c0_51] : memref<64x64xbf16, #tpu.memory_space<vmem>>, vector<64x64xbf16>
      %cst_52 = arith.constant dense<0.000000e+00> : vector<8x64xf32>
      %87 = tpu.matmul %83, %86, %cst_52 {dimension_numbers = #tpu.dot_dimension_numbers<[1], [0], [0], [1], [0, 0, 1, 1], [], []>} : vector<8x64xbf16>, vector<64x64xbf16>, vector<8x64xf32> -> vector<8x64xf32>
      %88 = arith.addf %85, %87 : vector<8x64xf32>
      %c0_53 = arith.constant 0 : index
      %c0_54 = arith.constant 0 : index
      %89 = vector.load %arg14[%c0_53, %c0_54] : memref<1x64xf32, #tpu.memory_space<vmem>>, vector<1x64xf32>
      %90 = vector.broadcast %89 : vector<1x64xf32> to vector<8x64xf32>
      %91 = arith.addf %88, %90 : vector<8x64xf32>
      %cst_55 = arith.constant 0.000000e+00 : f32
      %92 = vector.broadcast %cst_55 : f32 to vector<8x64xf32>
      %93 = arith.maximumf %91, %92 : vector<8x64xf32>
      %94 = arith.truncf %93 : vector<8x64xf32> to vector<8x64xbf16>
      %c0_56 = arith.constant 0 : index
      %c0_57 = arith.constant 0 : index
      %95 = vector.load %arg15[%c0_56, %c0_57] : memref<64x2xbf16, #tpu.memory_space<vmem>>, vector<64x2xbf16>
      %cst_58 = arith.constant dense<0.000000e+00> : vector<8x2xf32>
      %96 = tpu.matmul %94, %95, %cst_58 {dimension_numbers = #tpu.dot_dimension_numbers<[1], [0], [0], [1], [0, 0, 1, 1], [], []>} : vector<8x64xbf16>, vector<64x2xbf16>, vector<8x2xf32> -> vector<8x2xf32>
      %c0_59 = arith.constant 0 : index
      %c0_60 = arith.constant 0 : index
      %97 = vector.load %arg16[%c0_59, %c0_60] : memref<1x2xf32, #tpu.memory_space<vmem>>, vector<1x2xf32>
      %98 = vector.broadcast %97 : vector<1x2xf32> to vector<8x2xf32>
      %99 = arith.addf %96, %98 : vector<8x2xf32>
      %cst_61 = arith.constant dense<0xFF800000> : vector<8xf32>
      %100 = vector.multi_reduction <maximumf>, %99, %cst_61 [1] : vector<8x2xf32> to vector<8xf32>
      %101 = vector.shape_cast %100 : vector<8xf32> to vector<8x1xf32>
      %102 = vector.broadcast %101 : vector<8x1xf32> to vector<8x2xf32>
      %103 = arith.subf %99, %102 : vector<8x2xf32>
      %104 = math.exp %103 : vector<8x2xf32>
      %cst_62 = arith.constant dense<0.000000e+00> : vector<8xf32>
      %105 = vector.multi_reduction <add>, %104, %cst_62 [1] : vector<8x2xf32> to vector<8xf32>
      %106 = vector.shape_cast %105 : vector<8xf32> to vector<8x1xf32>
      %107 = vector.broadcast %106 : vector<8x1xf32> to vector<8x2xf32>
      %108 = arith.divf %104, %107 : vector<8x2xf32>
      %109 = vector.extract_strided_slice %108 {offsets = [0, 0], sizes = [8, 1], strides = [1, 1]} : vector<8x2xf32> to vector<8x1xf32>
      %110 = vector.broadcast %109 : vector<8x1xf32> to vector<8x640xf32>
      %111 = arith.mulf %63, %110 : vector<8x640xf32>
      %112 = arith.truncf %111 : vector<8x640xf32> to vector<8x640xbf16>
      %113 = vector.extract_strided_slice %108 {offsets = [0, 1], sizes = [8, 1], strides = [1, 1]} : vector<8x2xf32> to vector<8x1xf32>
      %114 = vector.broadcast %113 : vector<8x1xf32> to vector<8x64xf32>
      %115 = arith.mulf %82, %114 : vector<8x64xf32>
      %116 = arith.truncf %115 : vector<8x64xf32> to vector<8x64xbf16>
      %c0_63 = arith.constant 0 : index
      %c0_64 = arith.constant 0 : index
      %117 = vector.load %arg17[%c0_63, %c0_64] : memref<640x256xbf16, #tpu.memory_space<vmem>>, vector<640x256xbf16>
      %cst_65 = arith.constant dense<0.000000e+00> : vector<8x256xf32>
      %118 = tpu.matmul %112, %117, %cst_65 {dimension_numbers = #tpu.dot_dimension_numbers<[1], [0], [0], [1], [0, 0, 1, 1], [], []>} : vector<8x640xbf16>, vector<640x256xbf16>, vector<8x256xf32> -> vector<8x256xf32>
      %c0_66 = arith.constant 0 : index
      %c0_67 = arith.constant 0 : index
      %119 = vector.load %arg18[%c0_66, %c0_67] : memref<64x256xbf16, #tpu.memory_space<vmem>>, vector<64x256xbf16>
      %cst_68 = arith.constant dense<0.000000e+00> : vector<8x256xf32>
      %120 = tpu.matmul %116, %119, %cst_68 {dimension_numbers = #tpu.dot_dimension_numbers<[1], [0], [0], [1], [0, 0, 1, 1], [], []>} : vector<8x64xbf16>, vector<64x256xbf16>, vector<8x256xf32> -> vector<8x256xf32>
      %121 = arith.addf %118, %120 : vector<8x256xf32>
      %c0_69 = arith.constant 0 : index
      %c0_70 = arith.constant 0 : index
      %122 = vector.load %arg19[%c0_69, %c0_70] : memref<1x256xf32, #tpu.memory_space<vmem>>, vector<1x256xf32>
      %123 = vector.broadcast %122 : vector<1x256xf32> to vector<8x256xf32>
      %124 = arith.addf %121, %123 : vector<8x256xf32>
      %cst_71 = arith.constant 0.000000e+00 : f32
      %125 = vector.broadcast %cst_71 : f32 to vector<8x256xf32>
      %126 = arith.maximumf %124, %125 : vector<8x256xf32>
      %127 = arith.truncf %126 : vector<8x256xf32> to vector<8x256xbf16>
      %c0_72 = arith.constant 0 : index
      %c0_73 = arith.constant 0 : index
      %128 = vector.load %arg20[%c0_72, %c0_73] : memref<256x128xbf16, #tpu.memory_space<vmem>>, vector<256x128xbf16>
      %cst_74 = arith.constant dense<0.000000e+00> : vector<8x128xf32>
      %129 = tpu.matmul %127, %128, %cst_74 {dimension_numbers = #tpu.dot_dimension_numbers<[1], [0], [0], [1], [0, 0, 1, 1], [], []>} : vector<8x256xbf16>, vector<256x128xbf16>, vector<8x128xf32> -> vector<8x128xf32>
      %c0_75 = arith.constant 0 : index
      %c0_76 = arith.constant 0 : index
      %130 = vector.load %arg21[%c0_75, %c0_76] : memref<1x128xf32, #tpu.memory_space<vmem>>, vector<1x128xf32>
      %131 = vector.broadcast %130 : vector<1x128xf32> to vector<8x128xf32>
      %132 = arith.addf %129, %131 : vector<8x128xf32>
      %cst_77 = arith.constant 0.000000e+00 : f32
      %133 = vector.broadcast %cst_77 : f32 to vector<8x128xf32>
      %134 = arith.maximumf %132, %133 : vector<8x128xf32>
      %135 = arith.truncf %134 : vector<8x128xf32> to vector<8x128xbf16>
      %c0_78 = arith.constant 0 : index
      %c0_79 = arith.constant 0 : index
      %136 = vector.load %arg22[%c0_78, %c0_79] : memref<128x128xbf16, #tpu.memory_space<vmem>>, vector<128x128xbf16>
      %cst_80 = arith.constant dense<0.000000e+00> : vector<8x128xf32>
      %137 = tpu.matmul %135, %136, %cst_80 {dimension_numbers = #tpu.dot_dimension_numbers<[1], [0], [0], [1], [0, 0, 1, 1], [], []>} : vector<8x128xbf16>, vector<128x128xbf16>, vector<8x128xf32> -> vector<8x128xf32>
      %c0_81 = arith.constant 0 : index
      %c0_82 = arith.constant 0 : index
      %138 = vector.load %arg23[%c0_81, %c0_82] : memref<1x128xf32, #tpu.memory_space<vmem>>, vector<1x128xf32>
      %139 = vector.broadcast %138 : vector<1x128xf32> to vector<8x128xf32>
      %140 = arith.addf %137, %139 : vector<8x128xf32>
      %c0_83 = arith.constant 0 : index
      %c0_84 = arith.constant 0 : index
      %141 = vector.load %arg24[%c0_83, %c0_84] : memref<2x128xf32, #tpu.memory_space<vmem>>, vector<2x128xf32>
      %142 = vector.extract_strided_slice %108 {offsets = [0, 0], sizes = [8, 1], strides = [1, 1]} : vector<8x2xf32> to vector<8x1xf32>
      %143 = vector.extract_strided_slice %141 {offsets = [0, 0], sizes = [1, 128], strides = [1, 1]} : vector<2x128xf32> to vector<1x128xf32>
      %144 = vector.broadcast %142 : vector<8x1xf32> to vector<8x128xf32>
      %145 = vector.broadcast %143 : vector<1x128xf32> to vector<8x128xf32>
      %146 = arith.mulf %144, %145 : vector<8x128xf32>
      %147 = arith.addf %140, %146 : vector<8x128xf32>
      %148 = vector.extract_strided_slice %108 {offsets = [0, 1], sizes = [8, 1], strides = [1, 1]} : vector<8x2xf32> to vector<8x1xf32>
      %149 = vector.extract_strided_slice %141 {offsets = [1, 0], sizes = [1, 128], strides = [1, 1]} : vector<2x128xf32> to vector<1x128xf32>
      %150 = vector.broadcast %148 : vector<8x1xf32> to vector<8x128xf32>
      %151 = vector.broadcast %149 : vector<1x128xf32> to vector<8x128xf32>
      %152 = arith.mulf %150, %151 : vector<8x128xf32>
      %153 = arith.addf %147, %152 : vector<8x128xf32>
      %c0_85 = arith.constant 0 : index
      %c0_86 = arith.constant 0 : index
      %c0_87 = arith.constant 0 : index
      %154 = vector.load %arg25[%c0_85, %c0_86, %c0_87] : memref<1x8x128xf32, #tpu.memory_space<vmem>>, vector<1x8x128xf32>
      %155 = vector.shape_cast %154 : vector<1x8x128xf32> to vector<8x128xf32>
      %156 = vector.shape_cast %153 : vector<8x128xf32> to vector<1x8x128xf32>
      tpu.vector_store %arg25[%c0_85, %c0_86, %c0_87], %156 {strides = array<i32>} : memref<1x8x128xf32, #tpu.memory_space<vmem>>, vector<1x8x128xf32>,
    } else {
    }
    return
  }
  func.func @transform_0(%arg0: i32, %arg1: i32) -> (i32, i32, i32) {
    %c0_i32 = arith.constant 0 : i32
    %c0_i32_0 = arith.constant 0 : i32
    return %arg0, %arg1, %c0_i32 : i32, i32, i32
  }
  func.func @transform_1(%arg0: i32, %arg1: i32) -> (i32, i32, i32) {
    %c0_i32 = arith.constant 0 : i32
    %c0_i32_0 = arith.constant 0 : i32
    %c0_i32_1 = arith.constant 0 : i32
    return %arg0, %c0_i32, %c0_i32_0 : i32, i32, i32
  }
  func.func @transform_2(%arg0: i32, %arg1: i32) -> (i32, i32) {
    %c0_i32 = arith.constant 0 : i32
    %c0_i32_0 = arith.constant 0 : i32
    %c0_i32_1 = arith.constant 0 : i32
    return %c0_i32, %c0_i32_0 : i32, i32
  }
  func.func @transform_3(%arg0: i32, %arg1: i32) -> (i32, i32) {
    %c0_i32 = arith.constant 0 : i32
    %c0_i32_0 = arith.constant 0 : i32
    %c0_i32_1 = arith.constant 0 : i32
    return %c0_i32, %c0_i32_0 : i32, i32
  }
  func.func @transform_4(%arg0: i32, %arg1: i32) -> (i32, i32) {
    %c0_i32 = arith.constant 0 : i32
    %c0_i32_0 = arith.constant 0 : i32
    %c0_i32_1 = arith.constant 0 : i32
    return %c0_i32, %c0_i32_0 : i32, i32
  }
  func.func @transform_5(%arg0: i32, %arg1: i32) -> (i32, i32) {
    %c0_i32 = arith.constant 0 : i32
    %c0_i32_0 = arith.constant 0 : i32
    %c0_i32_1 = arith.constant 0 : i32
    return %c0_i32, %c0_i32_0 : i32, i32
  }
  func.func @transform_6(%arg0: i32, %arg1: i32) -> (i32, i32) {
    %c0_i32 = arith.constant 0 : i32
    %c0_i32_0 = arith.constant 0 : i32
    %c0_i32_1 = arith.constant 0 : i32
    return %c0_i32, %c0_i32_0 : i32, i32
  }
  func.func @transform_7(%arg0: i32, %arg1: i32) -> (i32, i32) {
    %c0_i32 = arith.constant 0 : i32
    %c0_i32_0 = arith.constant 0 : i32
    %c0_i32_1 = arith.constant 0 : i32
    return %c0_i32, %c0_i32_0 : i32, i32
  }
  func.func @transform_8(%arg0: i32, %arg1: i32) -> (i32, i32) {
    %c0_i32 = arith.constant 0 : i32
    %c0_i32_0 = arith.constant 0 : i32
    %c0_i32_1 = arith.constant 0 : i32
    return %c0_i32, %c0_i32_0 : i32, i32
  }
  func.func @transform_9(%arg0: i32, %arg1: i32) -> (i32, i32) {
    %c0_i32 = arith.constant 0 : i32
    %c0_i32_0 = arith.constant 0 : i32
    %c0_i32_1 = arith.constant 0 : i32
    return %c0_i32, %c0_i32_0 : i32, i32
  }
  func.func @transform_10(%arg0: i32, %arg1: i32) -> (i32, i32) {
    %c0_i32 = arith.constant 0 : i32
    %c0_i32_0 = arith.constant 0 : i32
    %c0_i32_1 = arith.constant 0 : i32
    return %c0_i32, %c0_i32_0 : i32, i32
  }
  func.func @transform_11(%arg0: i32, %arg1: i32) -> (i32, i32) {
    %c0_i32 = arith.constant 0 : i32
    %c0_i32_0 = arith.constant 0 : i32
    %c0_i32_1 = arith.constant 0 : i32
    return %c0_i32, %c0_i32_0 : i32, i32
  }
  func.func @transform_12(%arg0: i32, %arg1: i32) -> (i32, i32) {
    %c0_i32 = arith.constant 0 : i32
    %c0_i32_0 = arith.constant 0 : i32
    %c0_i32_1 = arith.constant 0 : i32
    return %c0_i32, %c0_i32_0 : i32, i32
  }
  func.func @transform_13(%arg0: i32, %arg1: i32) -> (i32, i32) {
    %c0_i32 = arith.constant 0 : i32
    %c0_i32_0 = arith.constant 0 : i32
    %c0_i32_1 = arith.constant 0 : i32
    return %c0_i32, %c0_i32_0 : i32, i32
  }
  func.func @transform_14(%arg0: i32, %arg1: i32) -> (i32, i32) {
    %c0_i32 = arith.constant 0 : i32
    %c0_i32_0 = arith.constant 0 : i32
    %c0_i32_1 = arith.constant 0 : i32
    return %c0_i32, %c0_i32_0 : i32, i32
  }
  func.func @transform_15(%arg0: i32, %arg1: i32) -> (i32, i32) {
    %c0_i32 = arith.constant 0 : i32
    %c0_i32_0 = arith.constant 0 : i32
    %c0_i32_1 = arith.constant 0 : i32
    return %c0_i32, %c0_i32_0 : i32, i32
  }
  func.func @transform_16(%arg0: i32, %arg1: i32) -> (i32, i32) {
    %c0_i32 = arith.constant 0 : i32
    %c0_i32_0 = arith.constant 0 : i32
    %c0_i32_1 = arith.constant 0 : i32
    return %c0_i32, %c0_i32_0 : i32, i32
  }
  func.func @transform_17(%arg0: i32, %arg1: i32) -> (i32, i32) {
    %c0_i32 = arith.constant 0 : i32
    %c0_i32_0 = arith.constant 0 : i32
    %c0_i32_1 = arith.constant 0 : i32
    return %c0_i32, %c0_i32_0 : i32, i32
  }
  func.func @transform_18(%arg0: i32, %arg1: i32) -> (i32, i32) {
    %c0_i32 = arith.constant 0 : i32
    %c0_i32_0 = arith.constant 0 : i32
    %c0_i32_1 = arith.constant 0 : i32
    return %c0_i32, %c0_i32_0 : i32, i32
  }
  func.func @transform_19(%arg0: i32, %arg1: i32) -> (i32, i32) {
    %c0_i32 = arith.constant 0 : i32
    %c0_i32_0 = arith.constant 0 : i32
    %c0_i32_1 = arith.constant 0 : i32
    return %c0_i32, %c0_i32_0 : i32, i32
  }
  func.func @transform_20(%arg0: i32, %arg1: i32) -> (i32, i32) {
    %c0_i32 = arith.constant 0 : i32
    %c0_i32_0 = arith.constant 0 : i32
    %c0_i32_1 = arith.constant 0 : i32
    return %c0_i32, %c0_i32_0 : i32, i32
  }
  func.func @transform_21(%arg0: i32, %arg1: i32) -> (i32, i32) {
    %c0_i32 = arith.constant 0 : i32
    %c0_i32_0 = arith.constant 0 : i32
    %c0_i32_1 = arith.constant 0 : i32
    return %c0_i32, %c0_i32_0 : i32, i32
  }
  func.func @transform_22(%arg0: i32, %arg1: i32) -> (i32, i32) {
    %c0_i32 = arith.constant 0 : i32
    %c0_i32_0 = arith.constant 0 : i32
    %c0_i32_1 = arith.constant 0 : i32
    return %c0_i32, %c0_i32_0 : i32, i32
  }
  func.func @transform_23(%arg0: i32, %arg1: i32) -> (i32, i32, i32) {
    %c0_i32 = arith.constant 0 : i32
    %c0_i32_0 = arith.constant 0 : i32
    %c0_i32_1 = arith.constant 0 : i32
    return %arg0, %c0_i32, %c0_i32_0 : i32, i32, i32
  }
}

</mosaic_0001>

<bundles_post_ra>
// kernel: forward.1
= control target key start
LH: loop header
LB: loop body
LE: loop exit
PB: predicated region body
PF: predicated region fallthrough
CT: control target
= control target key end

     0   :  { %s4337_s30 = smov 0   ;;  %s4339_s24 = smov 0   ;;  %s5321_s0 = inlined_call_operand.vmem [shape: bf16[2,64,27], index: 0, kind: input, shape index: {}]   ;;  %s5322_s1 = inlined_call_operand.vmem [shape: f32[2,8,4], index: 1, kind: input, shape index: {}]   ;;  %s5323_s2 = inlined_call_operand.vmem [shape: bf16[27,16], index: 2, kind: input, shape index: {}]   ;;  %s5324_s3 = inlined_call_operand.vmem [shape: f32[1,16], index: 3, kind: input, shape index: {}]   ;;  %s5325_s4 = inlined_call_operand.vmem [shape: bf16[16,640], index: 4, kind: input, shape index: {}]   ;;  %s5326_s5 = inlined_call_operand.vmem [shape: f32[1,640], index: 5, kind: input, shape index: {}]   ;;  %s5327_s6 = inlined_call_operand.vmem [shape: bf16[4,32], index: 6, kind: input, shape index: {}]   ;;  %s5328_s7 = inlined_call_operand.vmem [shape: f32[1,32], index: 7, kind: input, shape index: {}]   ;;  %s5329_s8 = inlined_call_operand.vmem [shape: bf16[32,64], index: 8, kind: input, shape index: {}]   ;;  %s5330_s9 = inlined_call_operand.vmem [shape: f32[1,64], index: 9, kind: input, shape index: {}]   ;;  %s5331_s10 = inlined_call_operand.vmem [shape: bf16[640,64], index: 10, kind: input, shape index: {}]   ;;  %s5332_s11 = inlined_call_operand.vmem [shape: bf16[64,64], index: 11, kind: input, shape index: {}]   ;;  %s5333_s12 = inlined_call_operand.vmem [shape: f32[1,64], index: 12, kind: input, shape index: {}]   ;;  %s5334_s13 = inlined_call_operand.vmem [shape: bf16[64,2], index: 13, kind: input, shape index: {}]   ;;  %s5335_s14 = inlined_call_operand.vmem [shape: f32[1,2], index: 14, kind: input, shape index: {}]   ;;  %s5336_s15 = inlined_call_operand.vmem [shape: bf16[640,256], index: 15, kind: input, shape index: {}]   ;;  %s5337_s16 = inlined_call_operand.vmem [shape: bf16[64,256], index: 16, kind: input, shape index: {}]   ;;  %s5338_s17 = inlined_call_operand.vmem [shape: f32[1,256], index: 17, kind: input, shape index: {}]   ;;  %s5339_s18 = inlined_call_operand.vmem [shape: bf16[256,128], index: 18, kind: input, shape index: {}]   ;;  %s5340_s19 = inlined_call_operand.vmem [shape: f32[1,128], index: 19, kind: input, shape index: {}]   ;;  %s5341_s20 = inlined_call_operand.vmem [shape: bf16[128,128], index: 20, kind: input, shape index: {}]   ;;  %s5342_s21 = inlined_call_operand.vmem [shape: f32[1,128], index: 21, kind: input, shape index: {}]   ;;  %s5343_s22 = inlined_call_operand.vmem [shape: f32[2,128], index: 22, kind: input, shape index: {}]   ;;  %s5344_s23 = inlined_call_operand.vmem [shape: f32[2,8,128], index: 23, kind: output, shape index: {}]  }
   0x1   :  { %5357 = sst [smem:[#allocation11_spill]] %s5321_s0 }
   0x2   :  { %5358 = sst [smem:[#allocation12_spill]] %s5322_s1 }
   0x3   :  { %5359 = sst [smem:[#allocation13_spill]] %s5323_s2 }
   0x4   :  { %5360 = sst [smem:[#allocation14_spill]] %s5324_s3 }
   0x5   :  { %5361 = sst [smem:[#allocation15_spill]] %s5325_s4  ;;  %s4335_s4 = smov 0  }
   0x6   :  { %5362 = sst [smem:[#allocation16_spill]] %s5326_s5 }
   0x7   :  { %5363 = sst [smem:[#allocation17_spill]] %s5327_s6 }
   0x8   :  { %5364 = sst [smem:[#allocation18_spill]] %s5328_s7 }
   0x9 LB: > { %s45_s25 = sadd.s32 1, %s4204_s30  ;;  %p3487_p0 = scmp.ge.s32.totalorder %s4208_s24, 1  ;;  %s4208_s24 = sphi %s4339_s24, %s33_s24   ;;  %s4204_s30 = sphi %s4337_s30, %s5395_s30   ;;  %s4200_s4 = sphi %s4335_s4, %s5394_s4  }
   0xa   : > { %p47_p1 = scmp.ge.s32.totalorder %s45_s25, 2  ;;  %p665_p2 = scmp.lt.s32.totalorder %s4208_s24, 3 }
   0xc   : > { %s5397_s25 = smov (%p47_p1, %s45_s25), 0  ;;  %p666_p3 = pnand %p3487_p0, %p665_p2 }
   0xe   : > { %669 = sbr.rel (%p666_p3) target bundleno = 2464 (0x9a0), region = 112 }
  0x13   : > { %s5365_s26 = sld [smem:[#allocation13_spill]]  ;;  %vm827_vm0 = vcmask 1044480   ;;  %vm828_vm1 = vcmask 1045504   ;;  %v4210_v1 = vmov 65535   ;;  %p737_p4 = scmp.lt.s32.totalorder %s4200_s4, 1  ;;  %vm814_vm2 = vcmask 220160  }
  0x14   : > { %v829_v2 = vsel %vm827_vm0, 4294967295, %v4210_v1  ;;  %s5366_s29 = sld [smem:[#allocation11_spill]]  ;;  %v5347_v14 = vmov 0   ;;  %vm1002_vm3 = vcmask 130048   ;;  %vm1634_vm7 = vcmask 1041408  }
  0x15   : > { %v830_v4 = vsel %vm828_vm1, %v829_v2, 0  ;;  %s5399_s4 = smov (!%p737_p4, %s4200_s4), 1  ;;  %s5367_s1 = sld [smem:[#allocation15_spill]]  ;;  %vm1466_vm8 = vcmask 523264   ;;  %vm4213_vm9 = vmmov 0   ;;  %vm1630_vm10 = vcmask 31744  }
  0x16   : > { %s3699_s27 = sshll.u32 %s5399_s4, 5  ;;  %s5368_s6 = sld [smem:[#allocation14_spill]]  ;;  %vm1703_vm11 = vcmask 261120   ;;  %vm2356_vm12 = vcmask 15360  }
  0x17   : > { %s5370_s28 = sld [smem:[#allocation16_spill]]  ;;  %s5355_s5 = sshll.u32 %s5399_s4, 3 }
  0x18   : > { %s5385_s0 = sld [smem:[#allocation17_spill]] }
  0x19   : > { %v3963_v0 = vld [vmem:[%s5365_s26 + $0x8] sm:$0x3f]   ;;  %v3964_v3 = vld [vmem:[%s5365_s26] sm:$0xff]  }
  0x1a   : > { %v832_v5 = vand.u32 %v3963_v0, %v830_v4  ;;  %s744_s3 = scalar_lea.vmem %s5366_s29, %s3699_s27  ;;  %s5388_s27 = sld [smem:[#allocation12_spill]] }
  0x1b   : > { %v3965_v6 = vld [vmem:[%s744_s3] sm:$0xff]   ;;  %v3966_v7 = vld [vmem:[%s744_s3 + $0x8] sm:$0xff]   ;;  %v3967_v8 = vld [vmem:[%s744_s3 + $0x10] sm:$0xff]  }
  0x1c   : > { %3815 = vmatprep.subr.bf16.mxu0 %v832_v5  ;;  %3927 = vmatprep.subr.bf16.mxu1 %v832_v5  ;;  %v3968_v9 = vld [vmem:[%s744_s3 + $0x18] sm:$0xff]   ;;  %v3974_v11 = vld [vmem:[%s5367_s1 + $0xc] ss:$20 sps:$4 sm:$0xff]   ;;  %v3975_v15 = vld [vmem:[%s5367_s1 + $0x10] ss:$20 sps:$4 sm:$0xff]  }
  0x1d   : > { %3816 = vmatpush3.bf16.msra.mxu0 %v832_v5  ;;  %3929 = vmatpush3.bf16.msra.mxu1 %v832_v5  ;;  %v3971_v10 = vld [vmem:[%s5367_s1 + $0x4] ss:$20 sps:$4 sm:$0xff]   ;;  %v3969_v12 = vld [vmem:[%s5367_s1] ss:$20 sps:$4 sm:$0xff]   ;;  %v3972_v13 = vld [vmem:[%s5367_s1 + $0x8] ss:$20 sps:$4 sm:$0xff]  }
  0x1e   : > { %3817 = vmatprep.subr.bf16.mxu0 %v3964_v3  ;;  %3928 = vmatprep.subr.bf16.mxu1 %v3964_v3  ;;  %v3492_v18 = vld [vmem:[%s5368_s6] ss:$0 sm:$0xff]  ;;  %s5393_s6 = sshll.u32 %s5399_s4, 3 }
  0x1f   : > { %3819 = vmatprep.mubr.msk.bf16.mxu0 %vm814_vm2, %v3965_v6  ;;  %3823 = vmatprep.mubr.msk.bf16.mxu1 %vm814_vm2, %v3967_v8 }
  0x20   : > { %s749_s7 = scalar_lea.vmem %s5388_s27, %s5355_s5  ;;  %s5389_s27 = sld [smem:[#allocation18_spill]] }
  0x21   : > { %3818 = vmatpush3.bf16.msra.mxu0 %v3964_v3  ;;  %3930 = vmatpush3.bf16.msra.mxu1 %v3964_v3 }
  0x22   : > { %1029 = vmatprep.subr.bf16.mxu1 %v3971_v10  ;;  %1102 = vmatprep.subr.bf16.mxu0 %v3974_v11 }
  0x24   : > { %3820 = vmatmul.mubr.msk.bf16.vlgmr.msra.gmra.mxu0 %vm814_vm2, %v3966_v7  ;;  %3824 = vmatmul.mubr.msk.bf16.vlgmr.msra.gmra.mxu1 %vm814_vm2, %v3968_v9 }
  0x25   : > { %1030 = vmatpush1.bf16.msra.mxu1 %v3969_v12  ;;  %1103 = vmatpush1.bf16.msra.mxu0 %v3972_v13  ;;  %v951_v13 = vlaneseq }
  0x26   : > { %1047 = vmatprep.mubr.bf16.mxu1 %v5347_v14  ;;  %1120 = vmatprep.mubr.bf16.mxu0 %v5347_v14 }
  0x27   : > { %3827 = vmatprep.subr.bf16.mxu1 %v3975_v15 }
  0xe4   : > { %v3821_v16 = vpop.f32.mrf.mxu0  ;;  %v3825_v17 = vpop.f32.mrf.mxu1 }
  0xe5   : > { %v877_v26 = vadd.f32 %v3821_v16, %v3492_v18  ;;  %v893_v49 = vadd.f32 %v3825_v17, %v3492_v18  ;;  %v949_v17 = vld [vmem:[%s5370_s28] sm:$0x1f]  ;;  %s753_s28 = scalar_lea.vmem %s5344_s23, %s5393_s6 }
  0xe6   : > { %v868_v19 = vpop.f32.mrf.mxu0  ;;  %v884_v20 = vpop.f32.mrf.mxu1 }
  0xe7   : > { %v869_v21 = vadd.f32 %v3492_v18, %v868_v19  ;;  %v901_v32 = vadd.f32 3.0, %v877_v26  ;;  %v885_v37 = vadd.f32 %v3492_v18, %v884_v20  ;;  %v905_v56 = vadd.f32 3.0, %v893_v49 }
  0xe8   : > { %v3822_v22 = vpop.f32.mrf.mxu0  ;;  %v3826_v25 = vpop.f32.mrf.mxu1 }
  0xe9   : > { %v899_v23 = vadd.f32 3.0, %v869_v21  ;;  %v880_v24 = vadd.f32 %v3822_v22, %v3492_v18  ;;  %v909_v39 = vmax.f32 %v901_v32, 0.0  ;;  %v903_v44 = vadd.f32 3.0, %v885_v37 }
  0xea   : > { %v871_v27 = vpop.f32.mrf.mxu0  ;;  %v887_v31 = vpop.f32.mrf.mxu1  ;;  %v896_v50 = vadd.f32 %v3826_v25, %v3492_v18  ;;  %v913_v62 = vmax.f32 %v905_v56, 0.0 }
  0xeb   : > { %v907_v28 = vmax.f32 %v899_v23, 0.0  ;;  %v902_v29 = vadd.f32 3.0, %v880_v24  ;;  %v872_v30 = vadd.f32 %v3492_v18, %v871_v27  ;;  %v888_v38 = vadd.f32 %v3492_v18, %v887_v31 }
  0xec   : > { %v917_v46 = vmin.f32 %v909_v39, 6.0  ;;  %v911_v53 = vmax.f32 %v903_v44, 0.0  ;;  %v906_v59 = vadd.f32 3.0, %v896_v50  ;;  %v921_v3 = vmin.f32 %v913_v62, 6.0 }
  0xed   : > { %v915_v33 = vmin.f32 %v907_v28, 6.0  ;;  %v900_v34 = vadd.f32 3.0, %v872_v30  ;;  %v910_v35 = vmax.f32 %v902_v29, 0.0  ;;  %v904_v45 = vadd.f32 3.0, %v888_v38 }
  0xee   : > { %v925_v55 = vmul.f32 %v917_v46, %v877_v26  ;;  %v919_v58 = vmin.f32 %v911_v53, 6.0  ;;  %v914_v1 = vmax.f32 %v906_v59, 0.0  ;;  %v929_v7 = vmul.f32 %v921_v3, %v893_v49 }
  0xef   : > { %v908_v36 = vmax.f32 %v900_v34, 0.0  ;;  %v923_v40 = vmul.f32 %v915_v33, %v869_v21  ;;  %v918_v42 = vmin.f32 %v910_v35, 6.0  ;;  %v912_v54 = vmax.f32 %v904_v45, 0.0 }
  0xf0   : > { %v933_v61 = vmul.f32 0.16666667, %v925_v55  ;;  %v927_v0 = vmul.f32 %v919_v58, %v885_v37  ;;  %v922_v5 = vmin.f32 %v914_v1, 6.0  ;;  %v937_v10 = vmul.f32 0.16666667, %v929_v7 }
  0xf1   : > { %v916_v41 = vmin.f32 %v908_v36, 6.0  ;;  %v931_v47 = vmul.f32 0.16666667, %v923_v40  ;;  %v926_v51 = vmul.f32 %v918_v42, %v880_v24  ;;  %v920_v60 = vmin.f32 %v912_v54, 6.0 }
  0xf2   : > { %v935_v4 = vmul.f32 0.16666667, %v927_v0  ;;  %v930_v8 = vmul.f32 %v922_v5, %v896_v50 }
  0xf3   : > { %v924_v43 = vmul.f32 %v916_v41, %v872_v30  ;;  %v934_v57 = vmul.f32 0.16666667, %v926_v51  ;;  %v928_v2 = vmul.f32 %v920_v60, %v888_v38 }
  0xf4   : > { %v938_v11 = vmul.f32 0.16666667, %v930_v8 }
  0xf5   : > { %v932_v48 = vmul.f32 0.16666667, %v924_v43  ;;  %v940_v63 = vpack.c.bf16 %v934_v57, %v933_v61  ;;  %v936_v6 = vmul.f32 0.16666667, %v928_v2  ;;  %v1449_v43 = vand.u32 127, %v951_v13 }
  0xf6   : > { %v942_v12 = vpack.c.bf16 %v938_v11, %v937_v10 }
  0xf7   : > { %v939_v52 = vpack.c.bf16 %v932_v48, %v931_v47  ;;  %v941_v9 = vpack.c.bf16 %v936_v6, %v935_v4 }
  0xf9   : > { %3508 = vmatmul.mubr.msk.bf16.vlgmr.msra.gmra.mxu1 %vm1002_vm3, %v939_v52  ;;  %3512 = vmatmul.mubr.msk.bf16.vlgmr.msra.gmra.mxu0 %vm1002_vm3, %v939_v52 }
  0xfa   : > { %1057 = vmatprep.mubr.bf16.mxu1 %v5347_v14  ;;  %1130 = vmatprep.mubr.bf16.mxu0 %v5347_v14 }
  0xfb   : > { %3828 = vmatpush3.bf16.msra.mxu1 %v3975_v15  ;;  %v952_v15 = vshrl.u32 %v951_v13, 7 }
  0xfd   : > { %v4409_v16 = vsub.s32 0, %v952_v15  ;;  %v961_v18 = vsub.s32 2, %v952_v15  ;;  %v4417_v22 = vsub.s32 1, %v952_v15  ;;  %v965_v26 = vsub.s32 3, %v952_v15 }
  0xfe   : > { %v1453_v35 = vmul.u32 64, %v952_v15  ;;  %v969_v56 = vsub.s32 4, %v952_v15 }
  0xff   : > { %5369 = vst [vmem:[#allocation3_spill] sm:$0xff] %v4409_v16  ;;  %v4415_v19 = vrot.slane %v949_v17, %v4409_v16  ;;  %5371 = vst [vmem:[#allocation4_spill] sm:$0xff] %v4417_v22  ;;  %v4419_v23 = vrot.slane %v949_v17, %v961_v18  ;;  %v4423_v28 = vrot.slane %v949_v17, %v4417_v22 }
 0x100   : > { %v4426_v34 = vrot.slane %v949_v17, %v965_v26  ;;  %v1455_v45 = vadd.s32 64, %v1453_v35  ;;  %vm4441_vm4 = vcmp.ge.s32.totalorder %v1449_v43, %v1453_v35  ;;  %v4460_v7 = vrot.slane %v949_v17, %v969_v56 }
 0x101   : > { %3509 = vmatmul.mubr.msk.bf16.gmra.mxu1 %vm1002_vm3, %v940_v63  ;;  %3513 = vmatmul.mubr.msk.bf16.gmra.mxu0 %vm1002_vm3, %v940_v63  ;;  %v5349_v26 = vmov 0.0  }
 0x102   : > { %1067 = vmatprep.mubr.bf16.mxu1 %v5347_v14  ;;  %1140 = vmatprep.mubr.bf16.mxu0 %v5347_v14  ;;  %vm1456_vm5 = vcmp.lt.s32.totalorder %v1449_v43, %v1455_v45 }
 0x103   : > { %vm1457_vm6 = vmand %vm4441_vm4, %vm1456_vm5 }
 0x109   : > { %3510 = vmatmul.mubr.msk.bf16.gmra.mxu1 %vm1002_vm3, %v941_v9  ;;  %3514 = vmatmul.mubr.msk.bf16.gmra.mxu0 %vm1002_vm3, %v941_v9 }
 0x10a   : > { %1077 = vmatprep.mubr.bf16.mxu1 %v5347_v14  ;;  %1150 = vmatprep.mubr.bf16.mxu0 %v5347_v14 }
 0x111   : > { %3511 = vmatmul.mubr.msk.bf16.gmra.mxu1 %vm1002_vm3, %v942_v12  ;;  %3515 = vmatmul.mubr.msk.bf16.gmra.mxu0 %vm1002_vm3, %v942_v12 }
 0x112   : > { %3829 = vmatprep.mubr.msk.bf16.mxu1 %vm1002_vm3, %v939_v52  ;;  %1543 = vmatprep.mubr.bf16.mxu0 %v5347_v14 }
 0x119   : > { %3830 = vmatmul.mubr.msk.bf16.vlgmr.msra.gmra.mxu1 %vm1002_vm3, %v940_v63 }
 0x11a   : > { %3833 = vmatprep.mubr.msk.bf16.mxu1 %vm1002_vm3, %v941_v9 }
 0x121   : > { %3834 = vmatmul.mubr.msk.bf16.gmra.mxu1 %vm1002_vm3, %v942_v12 }
 0x122   : > { %1502 = vmatprep.mubr.bf16.mxu1 %v5347_v14 }
 0x1b9   : > { %v1049_v20 = vpop.f32.mrf.mxu1  ;;  %v1122_v21 = vpop.f32.mrf.mxu0 }
 0x1ba   : > { %v1050_v27 = vadd.f32 %v1049_v20, %v4415_v19  ;;  %v1123_v31 = vadd.f32 %v1122_v21, %v4419_v23 }
 0x1bb   : > { %v1051_v24 = vpop.f32.mrf.mxu1  ;;  %v1124_v25 = vpop.f32.mrf.mxu0 }
 0x1bc   : > { %v1226_v36 = vadd.f32 3.0, %v1050_v27  ;;  %v1052_v37 = vadd.f32 %v1051_v24, %v4423_v28  ;;  %v1228_v40 = vadd.f32 3.0, %v1123_v31  ;;  %v4430_v44 = vadd.f32 %v1124_v25, %v4426_v34 }
 0x1bd   : > { %v1053_v29 = vpop.f32.mrf.mxu1  ;;  %v1126_v30 = vpop.f32.mrf.mxu0 }
 0x1be   : > { %v1266_v46 = vmax.f32 %v1226_v36, 0.0  ;;  %v1227_v47 = vadd.f32 3.0, %v1052_v37  ;;  %v4433_v50 = vadd.f32 %v1053_v29, %v4415_v19  ;;  %v1268_v53 = vmax.f32 %v1228_v40, 0.0 }
 0x1bf   : > { %v1055_v32 = vpop.f32.mrf.mxu1  ;;  %v1128_v33 = vpop.f32.mrf.mxu0  ;;  %v1229_v58 = vadd.f32 3.0, %v4430_v44  ;;  %v4447_v59 = vadd.f32 %v1126_v30, %v4419_v23  ;;  %v4474_v29 = vsel %vm1457_vm6, 1.0, %v5349_v26 }
 0x1c0   : > { %v4436_v51 = vadd.f32 %v1055_v32, %v4423_v28  ;;  %v4439_v52 = vadd.f32 %v1128_v33, %v4426_v34  ;;  %v1306_v61 = vmin.f32 %v1266_v46, 6.0  ;;  %v1267_v62 = vmax.f32 %v1227_v47, 0.0  ;;  %5374 = vst [vmem:[#allocation5_spill] sm:$0xff] %v4474_v29 }
 0x1c1   : > { %v1059_v38 = vpop.f32.mrf.mxu1  ;;  %v1132_v39 = vpop.f32.mrf.mxu0  ;;  %v1231_v2 = vadd.f32 3.0, %v4433_v50  ;;  %v1308_v5 = vmin.f32 %v1268_v53, 6.0  ;;  %v1269_v8 = vmax.f32 %v1229_v58, 0.0  ;;  %v1233_v9 = vadd.f32 3.0, %v4447_v59 }
 0x1c2   : > { %v4450_v60 = vadd.f32 %v1059_v38, %v4415_v19  ;;  %v1232_v3 = vadd.f32 3.0, %v4436_v51  ;;  %v1234_v4 = vadd.f32 3.0, %v4439_v52  ;;  %v4467_v11 = vadd.f32 %v1132_v39, %v4419_v23 }
 0x1c3   : > { %v1061_v41 = vpop.f32.mrf.mxu1  ;;  %v1134_v42 = vpop.f32.mrf.mxu0  ;;  %v1346_v12 = vmul.f32 %v1306_v61, %v1050_v27  ;;  %v1307_v13 = vmin.f32 %v1267_v62, 6.0  ;;  %v1271_v21 = vmax.f32 %v1231_v2, 0.0  ;;  %v4476_v30 = vmul.f32 %v1308_v5, %v1123_v31 }
 0x1c4   : > { %v4453_v63 = vadd.f32 %v1061_v41, %v4423_v28  ;;  %v1236_v10 = vadd.f32 3.0, %v4450_v60  ;;  %v4471_v18 = vadd.f32 %v1134_v42, %v4426_v34  ;;  %v1272_v24 = vmax.f32 %v1232_v3, 0.0 }
 0x1c5   : > { %v1063_v48 = vpop.f32.mrf.mxu1  ;;  %v1136_v49 = vpop.f32.mrf.mxu0  ;;  %v1274_v25 = vmax.f32 %v1234_v4, 0.0  ;;  %5375 = vst [vmem:[#allocation6_spill] sm:$0xff] %v4476_v30  ;;  %v1309_v36 = vmin.f32 %v1269_v8, 6.0  ;;  %v1273_v38 = vmax.f32 %v1233_v9, 0.0  ;;  %v1238_v40 = vadd.f32 3.0, %v4467_v11 }
 0x1c6   : > { %v1237_v15 = vadd.f32 3.0, %v4453_v63  ;;  %v4479_v32 = vadd.f32 %v1063_v48, %v4415_v19  ;;  %v1276_v39 = vmax.f32 %v1236_v10, 0.0  ;;  %v4490_v41 = vmul.f32 0.16666667, %v1346_v12 }
 0x1c7   : > { %v1065_v54 = vpop.f32.mrf.mxu1  ;;  %v1138_v55 = vpop.f32.mrf.mxu0  ;;  %v1347_v31 = vmul.f32 %v1307_v13, %v1052_v37  ;;  %v1239_v43 = vadd.f32 3.0, %v4471_v18  ;;  %v1311_v47 = vmin.f32 %v1271_v21, 6.0  ;;  %v1312_v48 = vmin.f32 %v1272_v24, 6.0 }
 0x1c8   : > { %v4482_v27 = vadd.f32 %v1065_v54, %v4423_v28  ;;  %v4485_v33 = vadd.f32 %v1138_v55, %v4426_v34  ;;  %5376 = vst [vmem:[#allocation7_spill] sm:$0xff] %v4490_v41  ;;  %v1277_v42 = vmax.f32 %v1237_v15, 0.0  ;;  %v1314_v53 = vmin.f32 %v1274_v25, 6.0 }
 0x1c9   : > { %v1069_v0 = vpop.f32.mrf.mxu1  ;;  %v4455_v1 = vpop.f32.mrf.mxu0  ;;  %v1241_v55 = vadd.f32 3.0, %v4479_v32  ;;  %v4500_v56 = vadd.f32 %v1136_v49, %v4419_v23  ;;  %v4505_v61 = vmul.f32 %v1309_v36, %v4430_v44  ;;  %v1313_v62 = vmin.f32 %v1273_v38, 6.0 }
 0x1ca   : > { %v4496_v54 = vadd.f32 %v1069_v0, %v4415_v19  ;;  %v1242_v57 = vadd.f32 3.0, %v4482_v27  ;;  %v1244_v37 = vadd.f32 3.0, %v4485_v33  ;;  %v1316_v2 = vmin.f32 %v1276_v39, 6.0 }
 0x1cb   : > { %v1071_v6 = vpop.f32.mrf.mxu1  ;;  %v1144_v17 = vpop.f32.mrf.mxu0  ;;  %v1278_v3 = vmax.f32 %v1238_v40, 0.0  ;;  %v4507_v4 = vmul.f32 0.16666667, %v1347_v31  ;;  %v1317_v0 = vmin.f32 %v1277_v42, 6.0  ;;  %v1279_v5 = vmax.f32 %v1239_v43, 0.0 }
 0x1cc   : > { %v1246_v8 = vadd.f32 3.0, %v4496_v54  ;;  %v4513_v10 = vmul.f32 %v1311_v47, %v4433_v50  ;;  %v1352_v12 = vmul.f32 %v1312_v48, %v4436_v51  ;;  %v1354_v44 = vmul.f32 %v1314_v53, %v4439_v52 }
 0x1cd   : > { %v1073_v20 = vpop.f32.mrf.mxu1  ;;  %v1146_v45 = vpop.f32.mrf.mxu0  ;;  %5377 = vst [vmem:[#allocation8_spill] sm:$0xff] %v4507_v4  ;;  %v4518_v13 = vadd.f32 %v1071_v6, %v4423_v28  ;;  %v1281_v15 = vmax.f32 %v1241_v55, 0.0  ;;  %v1243_v21 = vadd.f32 3.0, %v4500_v56  ;;  %v1282_v24 = vmax.f32 %v1242_v57, 0.0 }
 0x1ce   : > { %v1284_v25 = vmax.f32 %v1244_v37, 0.0  ;;  %v4524_v38 = vmul.f32 %v1313_v62, %v4447_v59  ;;  %v1356_v50 = vmul.f32 %v1316_v2, %v4450_v60  ;;  %v1318_v39 = vmin.f32 %v1278_v3, 6.0 }
 0x1cf   : > { %v4487_v35 = vpop.f32.mrf.mxu1  ;;  %v1148_v9 = vpop.f32.mrf.mxu0  ;;  %v4529_v51 = vadd.f32 %v4455_v1, %v4419_v23  ;;  %v1357_v52 = vmul.f32 %v1317_v0, %v4453_v63  ;;  %v1319_v6 = vmin.f32 %v1279_v5, 6.0  ;;  %v1286_v40 = vmax.f32 %v1246_v8, 0.0 }
 0x1d0   : > { %v4533_v31 = vadd.f32 %v1144_v17, %v4426_v34  ;;  %v4537_v47 = vmul.f32 0.16666667, %v1352_v12  ;;  %v4539_v59 = vmul.f32 0.16666667, %v1354_v44  ;;  %v1247_v60 = vadd.f32 3.0, %v4518_v13 }
 0x1d1   : > { %v4493_v46 = vpop.f32.mrf.mxu1  ;;  %v1152_v42 = vpop.f32.mrf.mxu0  ;;  %v4543_v48 = vadd.f32 %v1073_v20, %v4415_v19  ;;  %v1321_v1 = vmin.f32 %v1281_v15, 6.0  ;;  %v1283_v53 = vmax.f32 %v1243_v21, 0.0  ;;  %v1322_v63 = vmin.f32 %v1282_v24, 6.0 }
 0x1d2   : > { %5378 = vst [vmem:[#allocation9_spill] sm:$0xff] %v4537_v47  ;;  %5379 = vst [vmem:[#allocation10_spill] sm:$0xff] %v4539_v59  ;;  %v1324_v55 = vmin.f32 %v1284_v25, 6.0  ;;  %v4547_v17 = vmul.f32 0.16666667, %v1356_v50  ;;  %v4550_v37 = vmul.f32 %v1318_v39, %v4467_v11  ;;  %v1248_v62 = vadd.f32 3.0, %v4529_v51 }
 0x1d3   : > { %v1081_v58 = vpop.f32.mrf.mxu1  ;;  %v4554_v2 = vadd.f32 %v1146_v45, %v4419_v23  ;;  %v4556_v3 = vmul.f32 0.16666667, %v1357_v52  ;;  %v4559_v20 = vmul.f32 %v1319_v6, %v4471_v18  ;;  %v1326_v0 = vmin.f32 %v1286_v40, 6.0  ;;  %v1154_v8 = vpop.f32.mrf.mxu0 }
 0x1d4   : > { %v1249_v5 = vadd.f32 3.0, %v4533_v31  ;;  %v1287_v12 = vmax.f32 %v1247_v60, 0.0  ;;  %v1251_v44 = vadd.f32 3.0, %v4543_v48  ;;  %v4565_v11 = vadd.f32 %v4487_v35, %v4423_v28 }
 0x1d5   : > { %v4510_v49 = vpop.f32.mrf.mxu1  ;;  %v4568_v15 = vadd.f32 %v1148_v9, %v4426_v34  ;;  %v4571_v45 = vmul.f32 %v1321_v1, %v4479_v32  ;;  %v1323_v21 = vmin.f32 %v1283_v53, 6.0  ;;  %v1362_v18 = vmul.f32 %v1322_v63, %v4482_v27 }
 0x1d6   : > { %v1364_v24 = vmul.f32 %v1324_v55, %v4485_v33  ;;  %v1288_v50 = vmax.f32 %v1248_v62, 0.0  ;;  %v1253_v39 = vadd.f32 3.0, %v4554_v2  ;;  %v4580_v35 = vadd.f32 %v4493_v46, %v4415_v19  ;;  %v1156_v33 = vpop.f32.mrf.mxu0 }
 0x1d7   : > { %v4521_v36 = vpop.f32.mrf.mxu1  ;;  %v4583_v9 = vadd.f32 %v1081_v58, %v4423_v28  ;;  %v1366_v32 = vmul.f32 %v1326_v0, %v4496_v54  ;;  %v1289_v52 = vmax.f32 %v1249_v5, 0.0  ;;  %v4587_v6 = vadd.f32 %v1152_v42, %v4419_v23 }
 0x1d8   : > { %v4590_v27 = vadd.f32 %v1154_v8, %v4426_v34  ;;  %v1327_v40 = vmin.f32 %v1287_v12, 6.0  ;;  %v1291_v60 = vmax.f32 %v1251_v44, 0.0  ;;  %v1252_v1 = vadd.f32 3.0, %v4565_v11 }
 0x1d9   : > { %v4535_v43 = vpop.f32.mrf.mxu1  ;;  %v1254_v46 = vadd.f32 3.0, %v4568_v15  ;;  %v4595_v53 = vmul.f32 %v1323_v21, %v4500_v56  ;;  %v4597_v58 = vmul.f32 0.16666667, %v1362_v18  ;;  %v4599_v54 = vmul.f32 0.16666667, %v1364_v24  ;;  %v1158_v21 = vpop.f32.mrf.mxu0 }
 0x1da   : > { %v1257_v42 = vadd.f32 3.0, %v4583_v9  ;;  %v1328_v55 = vmin.f32 %v1288_v50, 6.0  ;;  %v1293_v62 = vmax.f32 %v1253_v39, 0.0  ;;  %v1256_v0 = vadd.f32 3.0, %v4580_v35 }
 0x1db   : > { %v4545_v57 = vpop.f32.mrf.mxu1  ;;  %v1259_v5 = vadd.f32 3.0, %v4590_v27  ;;  %v4606_v8 = vmul.f32 0.16666667, %v1366_v32  ;;  %v1329_v12 = vmin.f32 %v1289_v52, 6.0  ;;  %v1258_v56 = vadd.f32 3.0, %v4587_v6 }
 0x1dc   : > { %v1084_v44 = vadd.f32 %v4510_v49, %v4415_v19  ;;  %v1367_v18 = vmul.f32 %v1327_v40, %v4518_v13  ;;  %v1331_v24 = vmin.f32 %v1291_v60, 6.0  ;;  %v1292_v14 = vmax.f32 %v1252_v1, 0.0 }
 0x1dd   : > { %v4575_v25 = vpop.f32.mrf.mxu1  ;;  %v1294_v26 = vmax.f32 %v1254_v46, 0.0  ;;  %v1297_v50 = vmax.f32 %v1257_v42, 0.0  ;;  %v1157_v22 = vadd.f32 %v1156_v33, %v4419_v23  ;;  %v1086_v32 = vadd.f32 %v4521_v36, %v4423_v28 }
 0x1de   : > { %v1261_v39 = vadd.f32 3.0, %v1084_v44  ;;  %v1333_v52 = vmin.f32 %v1293_v62, 6.0  ;;  %v1296_v29 = vmax.f32 %v1256_v0, 0.0  ;;  %v1299_v41 = vmax.f32 %v1259_v5, 0.0 }
 0x1df   : > { %v4602_v63 = vpop.f32.mrf.mxu1  ;;  %v1159_v30 = vadd.f32 %v1158_v21, %v4426_v34  ;;  %v1298_v19 = vmax.f32 %v1258_v56, 0.0  ;;  %v1263_v59 = vadd.f32 3.0, %v1157_v22  ;;  %v1262_v13 = vadd.f32 3.0, %v1086_v32 }
 0x1e0   : > { %v1301_v49 = vmax.f32 %v1261_v39, 0.0  ;;  %v1369_v40 = vmul.f32 %v1329_v12, %v4533_v31  ;;  %v1371_v60 = vmul.f32 %v1331_v24, %v4543_v48  ;;  %v1332_v1 = vmin.f32 %v1292_v14, 6.0 }
 0x1e1   : > { %v3835_v16 = vpop.f32.mrf.mxu1  ;;  %v1264_v46 = vadd.f32 3.0, %v1159_v30  ;;  %v1337_v23 = vmin.f32 %v1297_v50, 6.0  ;;  %v1303_v42 = vmax.f32 %v1263_v59, 0.0  ;;  %v1302_v28 = vmax.f32 %v1262_v13, 0.0 }
 0x1e2   : > { %v1341_v33 = vmin.f32 %v1301_v49, 6.0  ;;  %v1334_v62 = vmin.f32 %v1294_v26, 6.0  ;;  %v1336_v0 = vmin.f32 %v1296_v29, 6.0  ;;  %v1339_v5 = vmin.f32 %v1299_v41, 6.0 }
 0x1e3   : > { %v1211_v36 = vpop.f32.mrf.mxu1  ;;  %v1304_v47 = vmax.f32 %v1264_v46, 0.0  ;;  %v1373_v34 = vmul.f32 %v1333_v52, %v4554_v2  ;;  %v1338_v56 = vmin.f32 %v1298_v19, 6.0  ;;  %v1343_v21 = vmin.f32 %v1303_v42, 6.0 }
 0x1e4   : > { %v1342_v39 = vmin.f32 %v1302_v28, 6.0  ;;  %v1407_v4 = vmul.f32 0.16666667, %v1367_v18  ;;  %v1372_v31 = vmul.f32 %v1332_v1, %v4565_v11  ;;  %v1381_v48 = vmul.f32 %v1341_v33, %v1084_v44 }
 0x1e5   : > { %v1344_v14 = vmin.f32 %v1304_v47, 6.0  ;;  %v1409_v12 = vmul.f32 0.16666667, %v1369_v40  ;;  %v1377_v24 = vmul.f32 %v1337_v23, %v4583_v9  ;;  %v1383_v59 = vmul.f32 %v1343_v21, %v1157_v22  ;;  %v3836_v49 = vpop.f32.mrf.mxu1 }
 0x1e6   : > { %v1382_v50 = vmul.f32 %v1342_v39, %v1086_v32  ;;  %v1374_v26 = vmul.f32 %v1334_v62, %v4568_v15  ;;  %v1376_v29 = vmul.f32 %v1336_v0, %v4580_v35  ;;  %v1379_v41 = vmul.f32 %v1339_v5, %v4590_v27 }
 0x1e7   : > { %v1384_v2 = vmul.f32 %v1344_v14, %v1159_v30  ;;  %v1411_v52 = vmul.f32 0.16666667, %v1371_v60  ;;  %v1413_v19 = vmul.f32 0.16666667, %v1373_v34  ;;  %v1378_v18 = vmul.f32 %v1338_v56, %v4587_v6  ;;  %v1214_v35 = vpop.f32.mrf.mxu1 }
 0x1e8   : > { %v1422_v11 = vmul.f32 0.16666667, %v1382_v50  ;;  %v1368_v47 = vmul.f32 %v1328_v55, %v4529_v51  ;;  %v1412_v44 = vmul.f32 0.16666667, %v1372_v31  ;;  %v1421_v13 = vmul.f32 0.16666667, %v1381_v48 }
 0x1e9   : > { %v1424_v9 = vmul.f32 0.16666667, %v1384_v2  ;;  %v1417_v22 = vmul.f32 0.16666667, %v1377_v24  ;;  %v1423_v32 = vmul.f32 0.16666667, %v1383_v59  ;;  %v1220_v40 = vadd.f32 %v3835_v16, %v4460_v7 }
 0x1ea   : > { %v4628_v15 = vadd.f32 %v1211_v36, %v4460_v7  ;;  %v1414_v27 = vmul.f32 0.16666667, %v1374_v26  ;;  %v1416_v30 = vmul.f32 0.16666667, %v1376_v29  ;;  %v1419_v60 = vmul.f32 0.16666667, %v1379_v41 }
 0x1eb   : > { %v1223_v1 = vadd.f32 %v3836_v49, %v4460_v7  ;;  %v1418_v6 = vmul.f32 0.16666667, %v1378_v18  ;;  %v4633_v51 = vadd.f32 %v4575_v25, %v4460_v7  ;;  %v1260_v55 = vadd.f32 3.0, %v1220_v40 }
 0x1ec   : > { %v1442_v46 = vpack.c.bf16 %v1422_v11, %v1417_v22  ;;  %v1441_v23 = vpack.c.bf16 %v1421_v13, %v1416_v30  ;;  %v1444_v42 = vpack.c.bf16 %v1424_v9, %v1419_v60  ;;  %v1215_v16 = vadd.f32 %v1214_v35, %v4460_v7  ;;  %v5384_v9 = vld [vmem:[#allocation7_spill] sm:$0xff]  ;;  %v5386_v60 = vld [vmem:[#allocation5_spill] sm:$0xff] }
 0x1ed   : > { %v1265_v33 = vadd.f32 3.0, %v1223_v1  ;;  %v1443_v28 = vpack.c.bf16 %v1423_v32, %v1418_v6  ;;  %v4638_v36 = vadd.f32 %v4535_v43, %v4460_v7  ;;  %v1250_v62 = vadd.f32 3.0, %v4628_v15 }
 0x1ee   : > { %1478 = vmatprep.subr.bf16.mxu1 %v1442_v46  ;;  %v1437_v0 = vpack.c.bf16 %v1412_v44, %v1407_v4  ;;  %v1300_v5 = vmax.f32 %v1260_v55, 0.0  ;;  %1519 = vmatprep.subr.bf16.mxu0 %v1444_v42  ;;  %v1255_v25 = vadd.f32 3.0, %v1215_v16  ;;  %v1439_v56 = vpack.c.bf16 %v1414_v27, %v1409_v12  ;;  %v5383_v44 = vld [vmem:[#allocation6_spill] sm:$0xff] }
 0x1ef   : > { %v1305_v34 = vmax.f32 %v1265_v33, 0.0  ;;  %1479 = vmatpush1.bf16.msra.mxu1 %v1441_v23  ;;  %v1399_v21 = vmul.f32 0.16666667, %v4559_v20  ;;  %v1401_v39 = vmul.f32 0.16666667, %v4571_v45  ;;  %v1436_v48 = vpack.c.bf16 %v1411_v52, %v4606_v8  ;;  %1520 = vmatpush1.bf16.msra.mxu0 %v1443_v28 }
 0x1f0   : > { %v1408_v31 = vmul.f32 0.16666667, %v1368_v47  ;;  %1480 = vmatprep.subr.bf16.mxu1 %v1437_v0  ;;  %v1245_v43 = vadd.f32 3.0, %v4633_v51  ;;  %v4647_v4 = vadd.f32 %v4602_v63, %v4460_v7  ;;  %v1295_v24 = vmax.f32 %v1255_v25, 0.0  ;;  %1521 = vmatprep.subr.bf16.mxu0 %v1439_v56 }
 0x1f1   : > { %v1345_v14 = vmin.f32 %v1305_v34, 6.0  ;;  %v1403_v12 = vmul.f32 0.16666667, %v4595_v53  ;;  %v4652_v20 = vadd.f32 %v4545_v57, %v4460_v7  ;;  %v1432_v45 = vpack.c.bf16 %v4597_v58, %v4556_v3 }
 0x1f2   : > { %v1438_v59 = vpack.c.bf16 %v1413_v19, %v1408_v31  ;;  %v1240_v8 = vadd.f32 3.0, %v4638_v36  ;;  %v1340_v50 = vmin.f32 %v1300_v5, 6.0  ;;  %v1290_v49 = vmax.f32 %v1250_v62, 0.0  ;;  %v5381_v19 = vld [vmem:[#allocation9_spill] sm:$0xff] }
 0x1f3   : > { %1481 = vmatpush1.bf16.msra.mxu1 %v1436_v48  ;;  %v1434_v63 = vpack.c.bf16 %v4599_v54, %v1399_v21  ;;  %v1389_v26 = vmul.f32 0.16666667, %v4505_v61  ;;  %v1391_v29 = vmul.f32 0.16666667, %v4513_v10  ;;  %v1398_v53 = vmul.f32 0.16666667, %v4550_v37 }
 0x1f4   : > { %v1431_v41 = vpack.c.bf16 %v1401_v39, %v4547_v17  ;;  %1522 = vmatpush1.bf16.msra.mxu0 %v1438_v59  ;;  %1482 = vmatprep.subr.bf16.mxu1 %v1432_v45  ;;  %v1285_v7 = vmax.f32 %v1245_v43, 0.0  ;;  %v1235_v57 = vadd.f32 3.0, %v4647_v4  ;;  %v1385_v3 = vmul.f32 %v1345_v14, %v1223_v1  ;;  %v5380_v61 = vld [vmem:[#allocation8_spill] sm:$0xff]  ;;  %v5382_v17 = vld [vmem:[#allocation10_spill] sm:$0xff]  ;;  %v3987_v45 = vld [vmem:[%s5332_s11 + $0x10] sm:$0xff]  }
 0x1f5   : > { %v1335_v58 = vmin.f32 %v1295_v24, 6.0  ;;  %1523 = vmatprep.subr.bf16.mxu0 %v1434_v63  ;;  %v1393_v2 = vmul.f32 0.16666667, %v4524_v38  ;;  %v1433_v52 = vpack.c.bf16 %v1403_v12, %v1398_v53  ;;  %v1230_v54 = vadd.f32 3.0, %v4652_v20  ;;  %v3976_v24 = vld [vmem:[%s5329_s8 + $0x8] sm:$0xff]   ;;  %v3977_v12 = vld [vmem:[%s5329_s8] sm:$0xff]  }
 0x1f6   : > { %v1427_v10 = vpack.c.bf16 %v5381_v19, %v5380_v61  ;;  %v1280_v18 = vmax.f32 %v1240_v8, 0.0  ;;  %v1380_v37 = vmul.f32 %v1340_v50, %v1220_v40  ;;  %v1330_v11 = vmin.f32 %v1290_v49, 6.0  ;;  %v1622_v40 = vld [vmem:[%s5385_s0] sm:$0x3]  ;;  %v3978_v59 = vld [vmem:[%s5331_s10 + $0x78] sm:$0xff]   ;;  %v3990_v8 = vld [vmem:[%s5332_s11 + $0x8] sm:$0xff]  }
 0x1f7   : > { %1483 = vmatpush1.bf16.msra.mxu1 %v1431_v41  ;;  %v1429_v47 = vpack.c.bf16 %v5382_v17, %v1389_v26  ;;  %v1388_v13 = vmul.f32 0.16666667, %v5383_v44  ;;  %v1426_v22 = vpack.c.bf16 %v1391_v29, %v5384_v9  ;;  %v1325_v38 = vmin.f32 %v1285_v7, 6.0  ;;  %v3524_v29 = vld [vmem:[%s5389_s27] ss:$0 sm:$0xff]  ;;  %v3981_v61 = vld [vmem:[%s5331_s10 + $0x30] sm:$0xff]  }
 0x1f8   : > { %1524 = vmatpush1.bf16.msra.mxu0 %v1433_v52  ;;  %1484 = vmatprep.subr.bf16.mxu1 %v1427_v10  ;;  %v1275_v32 = vmax.f32 %v1235_v57, 0.0  ;;  %v1425_v35 = vmul.f32 0.16666667, %v1385_v3  ;;  %v1375_v27 = vmul.f32 %v1335_v58, %v1215_v16  ;;  %v1460_v1 = vpack.c.bf16 %v5386_v60, %v5386_v60  ;;  %v3979_v58 = vld [vmem:[%s5331_s10 + $0x38] sm:$0xff]   ;;  %v3980_v52 = vld [vmem:[%s5331_s10 + $0x70] sm:$0xff]   ;;  %v3982_v19 = vld [vmem:[%s5331_s10 + $0x68] sm:$0xff]  }
 0x1f9   : > { %1525 = vmatprep.subr.bf16.mxu0 %v1429_v47  ;;  %v1428_v30 = vpack.c.bf16 %v1393_v2, %v1388_v13  ;;  %v1320_v6 = vmin.f32 %v1280_v18, 6.0  ;;  %v1270_v55 = vmax.f32 %v1230_v54, 0.0  ;;  %v1420_v46 = vmul.f32 0.16666667, %v1380_v37  ;;  %v3983_v10 = vld [vmem:[%s5331_s10 + $0x28] sm:$0xff]   ;;  %v3985_v18 = vld [vmem:[%s5331_s10 + $0x60] sm:$0xff]  }
 0x1fa   : > { %v1370_v23 = vmul.f32 %v1330_v11, %v4628_v15  ;;  %v5387_v33 = vmov 0.0   ;;  %v1636_v42 = vsel %vm1634_vm7, %v1622_v40, 0  ;;  %v1365_v16 = vmul.f32 %v1325_v38, %v4633_v51  ;;  %v1620_v51 = vld [vmem:[%s749_s7] sm:$0xff]  ;;  %v3988_v11 = vld [vmem:[%s5331_s10 + $0x58] sm:$0xff]   ;;  %v3991_v47 = vld [vmem:[%s5331_s10 + $0x50] sm:$0xff]  }
 0x1fb   : > { %1485 = vmatpush1.bf16.msra.mxu1 %v1426_v22  ;;  %v1315_v28 = vmin.f32 %v1275_v32, 6.0  ;;  %v1445_v62 = vpack.c.bf16 %v1425_v35, %v1420_v46  ;;  %v1415_v0 = vmul.f32 0.16666667, %v1375_v27  ;;  %v1360_v15 = vmul.f32 %v1320_v6, %v4638_v36  ;;  %v3986_v37 = vld [vmem:[%s5331_s10 + $0x20] sm:$0xff]   ;;  %v3989_v17 = vld [vmem:[%s5331_s10 + $0x18] sm:$0xff]   ;;  %v3992_v44 = vld [vmem:[%s5331_s10 + $0x10] sm:$0xff]  }
 0x1fc   : > { %1526 = vmatpush1.bf16.msra.mxu0 %v1428_v30  ;;  %3837 = vmatprep.subr.bf16.mxu1 %v5387_v33  ;;  %v1310_v5 = vmin.f32 %v1270_v55, 6.0  ;;  %v1410_v34 = vmul.f32 0.16666667, %v1370_v23  ;;  %v1405_v25 = vmul.f32 0.16666667, %v1365_v16  ;;  %v1621_v31 = vpack.c.bf16 %v1620_v51, %v1620_v51  ;;  %v3993_v13 = vld [vmem:[%s5332_s11] sm:$0xff]  }
 0x1fd   : > { %3849 = vmatprep.subr.bf16.mxu0 %v5387_v33  ;;  %v1355_v56 = vmul.f32 %v1315_v28, %v4647_v4  ;;  %v1400_v36 = vmul.f32 0.16666667, %v1360_v15  ;;  %v3994_v22 = vld [vmem:[%s5331_s10 + $0x48] sm:$0xff]   ;;  %v3996_v38 = vld [vmem:[%s5331_s10 + $0xf8] sm:$0xff]   ;;  %v3998_v40 = vld [vmem:[%s5331_s10 + $0x40] sm:$0xff]  }
 0x1fe   : > { %3521 = vmatmul.mubr.msk.bf16.vlgmr.msra.gmra.mxu1 %vm1466_vm8, %v1460_v1  ;;  %v1440_v21 = vpack.c.bf16 %v1415_v0, %v1410_v34  ;;  %v1350_v39 = vmul.f32 %v1310_v5, %v4652_v20  ;;  %v3984_v20 = vld [vmem:[%s5332_s11 + $0x18] sm:$0xff]   ;;  %v3995_v35 = vld [vmem:[%s5331_s10 + $0x8] sm:$0xff]   ;;  %v3999_v55 = vld [vmem:[%s5331_s10] sm:$0xff]  }
 0x1ff   : > { %3522 = vmatmul.mubr.msk.bf16.vlgmr.msra.gmra.mxu0 %vm1466_vm8, %v1460_v1  ;;  %3838 = vmatpush3.bf16.msra.mxu1 %v1445_v62  ;;  %v1435_v48 = vpack.c.bf16 %v1405_v25, %v1400_v36  ;;  %v1395_v43 = vmul.f32 0.16666667, %v1355_v56  ;;  %v4002_v23 = vld [vmem:[%s5331_s10 + $0x138] sm:$0xff]   ;;  %v4008_v16 = vld [vmem:[%s5331_s10 + $0x128] sm:$0xff]   ;;  %v4011_v28 = vld [vmem:[%s5331_s10 + $0x120] sm:$0xff]  }
 0x200   : > { %3839 = vmatprep.subr.bf16.mxu1 %v5387_v33  ;;  %3850 = vmatpush3.bf16.msra.mxu0 %v1636_v42  ;;  %v1390_v4 = vmul.f32 0.16666667, %v1350_v39  ;;  %v4005_v42 = vld [vmem:[%s5331_s10 + $0x130] sm:$0xff]   ;;  %v4014_v62 = vld [vmem:[%s5331_s10 + $0x118] sm:$0xff]   ;;  %v4020_v5 = vld [vmem:[%s5331_s10 + $0x108] sm:$0xff]  }
 0x201   : > { %3851 = vmatprep.mubr.msk.bf16.mxu0 %vm4213_vm9, %v5387_v33  ;;  %3855 = vmatprep.subr.bf16.mxu0 %v5387_v33  ;;  %v4017_v0 = vld [vmem:[%s5331_s10 + $0x110] sm:$0xff]   ;;  %v4021_v56 = vld [vmem:[%s5331_s10 + $0x100] sm:$0xff]  }
 0x202   : > { %3845 = vmatprep.mubr.msk.bf16.mxu1 %vm4213_vm9, %v5387_v33  ;;  %v1430_v14 = vpack.c.bf16 %v1395_v43, %v1390_v4  ;;  %v3526_v39 = vld [vmem:[%s5330_s9] ss:$0 sm:$0xff] }
 0x203   : > { %3840 = vmatpush3.bf16.msra.mxu1 %v1440_v21 }
 0x204   : > { %3841 = vmatprep.subr.bf16.mxu1 %v5387_v33 }
 0x207   : > { %3852 = vmatmul.mubr.msk.bf16.vlgmr.msra.gmra.mxu0 %vm1630_vm10, %v1621_v31  ;;  %3842 = vmatpush3.bf16.msra.mxu1 %v1435_v48 }
 0x208   : > { %3843 = vmatprep.subr.bf16.mxu1 %v5387_v33  ;;  %3859 = vmatprep.mubr.msk.bf16.mxu0 %vm4213_vm9, %v5387_v33 }
 0x209   : > { %3856 = vmatpush3.bf16.msra.mxu0 %v3976_v24  ;;  %v3997_v24 = vld [vmem:[%s5331_s10 + $0xb8] sm:$0xff]  }
 0x20a   : > { %3857 = vmatprep.subr.bf16.mxu0 %v5387_v33 }
 0x20b   : > { %3844 = vmatpush3.bf16.msra.mxu1 %v1430_v14 }
 0x20c   : > { %3863 = vmatprep.subr.bf16.mxu1 %v5387_v33 }
 0x20d   : > { %3858 = vmatpush3.bf16.msra.mxu0 %v3977_v12 }
 0x20e   : > { %3846 = vmatmul.mubr.msk.bf16.vlgmr.msra.gmra.mxu1 %vm1466_vm8, %v1460_v1  ;;  %3726 = vmatprep.subr.bf16.mxu0 %v3978_v59 }
 0x20f   : > { %3871 = vmatprep.mubr.msk.bf16.mxu1 %vm4213_vm9, %v5387_v33  ;;  %3864 = vmatpush3.bf16.msra.mxu1 %v3984_v20  ;;  %v4000_v20 = vld [vmem:[%s5331_s10 + $0xf0] sm:$0xff]  }
 0x210   : > { %3865 = vmatprep.subr.bf16.mxu1 %v5387_v33 }
 0x213   : > { %3866 = vmatpush3.bf16.msra.mxu1 %v3987_v45 }
 0x214   : > { %3867 = vmatprep.subr.bf16.mxu1 %v5387_v33 }
 0x217   : > { %3868 = vmatpush3.bf16.msra.mxu1 %v3990_v8 }
 0x218   : > { %3869 = vmatprep.subr.bf16.mxu1 %v5387_v33 }
 0x21b   : > { %3870 = vmatpush3.bf16.msra.mxu1 %v3993_v13  ;;  %v4024_v13 = vld [vmem:[%s5334_s13 + $0x8] sm:$0xff]  }
 0x21c   : > { %3748 = vmatprep.subr.bf16.mxu1 %v3996_v38 }
 0x2be   : > { %v1504_v9 = vpop.f32.mrf.mxu1 }
 0x2bf   : > { %v4727_v50 = vpop.f32.mrf.mxu0  ;;  %v4786_v1 = vmul.f32 0.015625, %v1504_v9 }
 0x2c0   : > { %v1506_v32 = vpop.f32.mrf.mxu1 }
 0x2c1   : > { %v4729_v49 = vpop.f32.mrf.mxu0  ;;  %v4779_v27 = vmul.f32 0.015625, %v1506_v32  ;;  %v1615_v46 = vpack.c.bf16 %v4786_v1, %v4786_v1 }
 0x2c2   : > { %v1508_v30 = vpop.f32.mrf.mxu1  ;;  %v4835_v43 = vmul.f32 0.015625, %v4729_v49  ;;  %v4001_v49 = vld [vmem:[%s5331_s10 + $0xb0] sm:$0xff]  }
 0x2c3   : > { %v1549_v63 = vpop.f32.mrf.mxu0  ;;  %v1616_v60 = vpack.c.bf16 %v4779_v27, %v4779_v27 }
 0x2c4   : > { %v1509_v6 = vpop.f32.mrf.mxu1  ;;  %v1618_v45 = vpack.c.bf16 %v4835_v43, %v4835_v43  ;;  %v4003_v63 = vld [vmem:[%s5331_s10 + $0xe8] sm:$0xff]  }
 0x2c5   : > { %v1550_v26 = vpop.f32.mrf.mxu0 }
 0x2c6   : > { %v4004_v26 = vld [vmem:[%s5331_s10 + $0xa8] sm:$0xff]  }
 0x2c7   : > { %v1672_v53 = vpop.f32.mrf.mxu0 }
 0x2c8   : > { %v1673_v41 = vadd.f32 %v3524_v29, %v1672_v53  ;;  %v4006_v29 = vld [vmem:[%s5331_s10 + $0xe0] sm:$0xff]  }
 0x2c9   : > { %v3853_v7 = vpop.f32.mrf.mxu0  ;;  %v4007_v53 = vld [vmem:[%s5331_s10 + $0xa0] sm:$0xff]  }
 0x2ca   : > { %v1678_v57 = vmax.f32 %v1673_v41, 0.0  ;;  %v4009_v41 = vld [vmem:[%s5331_s10 + $0xd8] sm:$0xff]  }
 0x2cb   : > { %v1675_v3 = vpop.f32.mrf.mxu0  ;;  %v4010_v7 = vld [vmem:[%s5331_s10 + $0x98] sm:$0xff]  }
 0x2cc   : > { %v1679_v2 = vpack.c.bf16 %v1678_v57, %v1678_v57  ;;  %v4012_v57 = vld [vmem:[%s5331_s10 + $0xd0] sm:$0xff]  }
 0x2cd   : > { %v3854_v54 = vpop.f32.mrf.mxu0  ;;  %v4013_v3 = vld [vmem:[%s5331_s10 + $0x90] sm:$0xff]  }
 0x2ce   : > { %3860 = vmatmul.mubr.msk.bf16.vlgmr.msra.gmra.mxu0 %vm1703_vm11, %v1679_v2  ;;  %v1586_v15 = vpop.f32.mrf.mxu1  ;;  %v4016_v2 = vld [vmem:[%s5331_s10 + $0x88] sm:$0xff]   ;;  %v4019_v54 = vld [vmem:[%s5331_s10 + $0x80] sm:$0xff]  }
 0x2cf   : > { %3727 = vmatpush3.bf16.msra.mxu0 %v3979_v58  ;;  %2176 = vmatprep.mubr.bf16.mxu0 %v1616_v60  ;;  %v4823_v51 = vmul.f32 0.015625, %v1586_v15  ;;  %v4015_v58 = vld [vmem:[%s5331_s10 + $0xc8] sm:$0xff]  }
 0x2d0   : > { %3728 = vmatprep.subr.bf16.mxu0 %v3980_v52  ;;  %v3847_v34 = vpop.f32.mrf.mxu1  ;;  %v4018_v52 = vld [vmem:[%s5331_s10 + $0xc0] sm:$0xff]  }
 0x2d1   : > { %v1619_v36 = vpack.c.bf16 %v4823_v51, %v4823_v51 }
 0x2d2   : > { %v1589_v25 = vpop.f32.mrf.mxu1 }
 0x2d3   : > { %3729 = vmatpush3.bf16.msra.mxu0 %v3981_v61  ;;  %v4890_v61 = vmul.f32 0.015625, %v4727_v50  ;;  %v4022_v50 = vld [vmem:[%s5334_s13 + $0x18] sm:$0xff]   ;;  %v5390_v25 = vmov 0  }
 0x2d4   : > { %3730 = vmatprep.subr.bf16.mxu0 %v3982_v19  ;;  %v3848_v21 = vpop.f32.mrf.mxu1 }
 0x2d5   : > { %v1617_v19 = vpack.c.bf16 %v4890_v61, %v4890_v61 }
 0x2d7   : > { %3731 = vmatpush3.bf16.msra.mxu0 %v3983_v10 }
 0x2d8   : > { %3732 = vmatprep.subr.bf16.mxu0 %v3985_v18 }
 0x2db   : > { %3733 = vmatpush3.bf16.msra.mxu0 %v3986_v37 }
 0x2dc   : > { %3734 = vmatprep.subr.bf16.mxu0 %v3988_v11 }
 0x2df   : > { %3735 = vmatpush3.bf16.msra.mxu0 %v3989_v17 }
 0x2e0   : > { %3736 = vmatprep.subr.bf16.mxu0 %v3991_v47  ;;  %v4023_v47 = vld [vmem:[%s5334_s13 + $0x10] sm:$0xff]  }
 0x2e3   : > { %3737 = vmatpush3.bf16.msra.mxu0 %v3992_v44 }
 0x2e4   : > { %3738 = vmatprep.subr.bf16.mxu0 %v3994_v22  ;;  %v4025_v22 = vld [vmem:[%s5334_s13] sm:$0xff]  }
 0x2e7   : > { %3739 = vmatpush3.bf16.msra.mxu0 %v3995_v35 }
 0x2e8   : > { %3740 = vmatprep.subr.bf16.mxu0 %v3998_v40 }
 0x2eb   : > { %3741 = vmatpush3.bf16.msra.mxu0 %v3999_v55 }
 0x2ec   : > { %3875 = vmatprep.subr.bf16.mxu0 %v5387_v33 }
 0x2ee   : > { %2177 = vmatmul.mubr.bf16.vlgmr.msra.gmra.mxu0 %v1615_v46 }
 0x2ef   : > { %3876 = vmatpush3.bf16.msra.mxu0 %v4002_v23  ;;  %3891 = vmatprep.mubr.msk.bf16.mxu0 %vm4213_vm9, %v5387_v33 }
 0x2f0   : > { %3877 = vmatprep.subr.bf16.mxu0 %v5387_v33 }
 0x2f3   : > { %3878 = vmatpush3.bf16.msra.mxu0 %v4005_v42 }
 0x2f4   : > { %3879 = vmatprep.subr.bf16.mxu0 %v5387_v33 }
 0x2f7   : > { %3880 = vmatpush3.bf16.msra.mxu0 %v4008_v16 }
 0x2f8   : > { %3881 = vmatprep.subr.bf16.mxu0 %v5387_v33 }
 0x2fb   : > { %3882 = vmatpush3.bf16.msra.mxu0 %v4011_v28 }
 0x2fc   : > { %3883 = vmatprep.subr.bf16.mxu0 %v5387_v33 }
 0x2ff   : > { %3884 = vmatpush3.bf16.msra.mxu0 %v4014_v62  ;;  %v3575_v62 = vld [vmem:[%s5333_s12] ss:$0 sm:$0xff] }
 0x300   : > { %3885 = vmatprep.subr.bf16.mxu0 %v5387_v33 }
 0x303   : > { %3886 = vmatpush3.bf16.msra.mxu0 %v4017_v0 }
 0x304   : > { %3887 = vmatprep.subr.bf16.mxu0 %v5387_v33 }
 0x307   : > { %3888 = vmatpush3.bf16.msra.mxu0 %v4020_v5 }
 0x308   : > { %3889 = vmatprep.subr.bf16.mxu0 %v5387_v33 }
 0x30b   : > { %3890 = vmatpush3.bf16.msra.mxu0 %v4021_v56  ;;  %v3576_v56 = vld [vmem:[%s5335_s14] ss:$0 sm:$0xff] }
 0x30e   : > { %3892 = vmatmul.mubr.bf16.vlgmr.msra.gmra.mxu0 %v1619_v36 }
 0x38e   : > { %v1741_v31 = vpop.f32.mrf.mxu0 }
 0x38f   : > { %v1742_v48 = vadd.f32 %v3526_v39, %v1741_v31 }
 0x390   : > { %v3861_v4 = vpop.f32.mrf.mxu0 }
 0x391   : > { %v4837_v14 = vmax.f32 %v1742_v48, 0.0 }
 0x392   : > { %v1744_v12 = vpop.f32.mrf.mxu0 }
 0x393   : > { %v1748_v59 = vpack.c.bf16 %v4837_v14, %v4837_v14 }
 0x394   : > { %v3862_v8 = vpop.f32.mrf.mxu0 }
 0x395   : > { %3872 = vmatmul.mubr.msk.bf16.vlgmr.msra.gmra.mxu1 %vm1466_vm8, %v1748_v59  ;;  %v4214_v8 = vmov 1  }
 0x396   : > { %3749 = vmatpush3.bf16.msra.mxu1 %v3997_v24  ;;  %2216 = vmatprep.mubr.bf16.mxu1 %v1618_v45 }
 0x397   : > { %3750 = vmatprep.subr.bf16.mxu1 %v4000_v20  ;;  %3960 = vset.pattern.permute.xlu1 %v4214_v8 }
 0x398   : > { %3962 = vset.pattern.permute.xlu0 %v4214_v8 }
 0x39a   : > { %3751 = vmatpush3.bf16.msra.mxu1 %v4001_v49  ;;  %v4026_v49 = vld [vmem:[%s5336_s15 + $0x70] ss:$8 sps:$4 sm:$0xff]  }
 0x39b   : > { %3752 = vmatprep.subr.bf16.mxu1 %v4003_v63  ;;  %v4028_v63 = vld [vmem:[%s5336_s15 + $0x74] ss:$8 sps:$4 sm:$0xff]  }
 0x39c   : > { %2961 = vmatprep.subr.bf16.mxu0 %v4028_v63 }
 0x39d   : > { %2962 = vmatpush1.bf16.msra.mxu0 %v4026_v49  ;;  %v4092_v49 = vld [vmem:[%s5336_s15 + $0x270] ss:$8 sps:$4 sm:$0xff]  }
 0x39e   : > { %3753 = vmatpush3.bf16.msra.mxu1 %v4004_v26  ;;  %v4031_v26 = vld [vmem:[%s5336_s15 + $0x64] ss:$8 sps:$4 sm:$0xff]  }
 0x39f   : > { %3754 = vmatprep.subr.bf16.mxu1 %v4006_v29  ;;  %v4029_v29 = vld [vmem:[%s5336_s15 + $0x60] ss:$8 sps:$4 sm:$0xff]   ;;  %2963 = vmatprep.subr.bf16.mxu0 %v4031_v26  ;;  %v4097_v26 = vld [vmem:[%s5336_s15 + $0x154] ss:$8 sps:$4 sm:$0xff]  }
 0x3a1   : > { %2964 = vmatpush1.bf16.msra.mxu0 %v4029_v29  ;;  %v4098_v29 = vld [vmem:[%s5336_s15 + $0x260] ss:$8 sps:$4 sm:$0xff]  }
 0x3a2   : > { %3755 = vmatpush3.bf16.msra.mxu1 %v4007_v53  ;;  %v4034_v53 = vld [vmem:[%s5336_s15 + $0x54] ss:$8 sps:$4 sm:$0xff]  }
 0x3a3   : > { %3756 = vmatprep.subr.bf16.mxu1 %v4009_v41  ;;  %v4032_v41 = vld [vmem:[%s5336_s15 + $0x50] ss:$8 sps:$4 sm:$0xff]   ;;  %2965 = vmatprep.subr.bf16.mxu0 %v4034_v53  ;;  %v4106_v53 = vld [vmem:[%s5336_s15 + $0x254] ss:$8 sps:$4 sm:$0xff]  }
 0x3a5   : > { %2966 = vmatpush1.bf16.msra.mxu0 %v4032_v41  ;;  %v4101_v41 = vld [vmem:[%s5336_s15 + $0x140] ss:$8 sps:$4 sm:$0xff]  }
 0x3a6   : > { %3757 = vmatpush3.bf16.msra.mxu1 %v4010_v7  ;;  %v4059_v7 = vld [vmem:[%s5337_s16 + $0x30] ss:$8 sps:$4 sm:$0xff]  }
 0x3a7   : > { %3758 = vmatprep.subr.bf16.mxu1 %v4012_v57  ;;  %v4061_v57 = vld [vmem:[%s5337_s16 + $0x34] ss:$8 sps:$4 sm:$0xff]  }
 0x3aa   : > { %3759 = vmatpush3.bf16.msra.mxu1 %v4013_v3  ;;  %v4037_v3 = vld [vmem:[%s5336_s15 + $0x44] ss:$8 sps:$4 sm:$0xff]  }
 0x3ab   : > { %3760 = vmatprep.subr.bf16.mxu1 %v4015_v58  ;;  %v4067_v58 = vld [vmem:[%s5337_s16 + $0x24] ss:$8 sps:$4 sm:$0xff]   ;;  %2967 = vmatprep.subr.bf16.mxu0 %v4037_v3  ;;  %v4107_v3 = vld [vmem:[%s5336_s15 + $0x130] ss:$8 sps:$4 sm:$0xff]  }
 0x3ae   : > { %3761 = vmatpush3.bf16.msra.mxu1 %v4016_v2  ;;  %v3742_v10 = vpop.f32.mrf.mxu0  ;;  %v4065_v2 = vld [vmem:[%s5337_s16 + $0x20] ss:$8 sps:$4 sm:$0xff]  }
 0x3af   : > { %3762 = vmatprep.subr.bf16.mxu1 %v4018_v52  ;;  %v4035_v52 = vld [vmem:[%s5336_s15 + $0x40] ss:$8 sps:$4 sm:$0xff]  }
 0x3b0   : > { %v3743_v18 = vpop.f32.mrf.mxu0  ;;  %2968 = vmatpush1.bf16.msra.mxu0 %v4035_v52  ;;  %v4118_v52 = vld [vmem:[%s5336_s15 + $0x234] ss:$8 sps:$4 sm:$0xff]  }
 0x3b1   : > { %v3744_v37 = vadd.f32 %v3743_v18, %v3742_v10  ;;  %v4071_v10 = vld [vmem:[%s5337_s16 + $0x10] ss:$8 sps:$4 sm:$0xff]  }
 0x3b2   : > { %3763 = vmatpush3.bf16.msra.mxu1 %v4019_v54  ;;  %v3745_v11 = vpop.f32.mrf.mxu0  ;;  %v4073_v54 = vld [vmem:[%s5337_s16 + $0x14] ss:$8 sps:$4 sm:$0xff]   ;;  %v4038_v18 = vld [vmem:[%s5336_s15 + $0x30] ss:$8 sps:$4 sm:$0xff]  }
 0x3b3   : > { %3895 = vmatprep.subr.bf16.mxu1 %v5387_v33  ;;  %v4043_v11 = vld [vmem:[%s5336_s15 + $0x24] ss:$8 sps:$4 sm:$0xff]  }
 0x3b4   : > { %v3746_v17 = vpop.f32.mrf.mxu0 }
 0x3b5   : > { %2217 = vmatmul.mubr.bf16.vlgmr.msra.gmra.mxu1 %v1617_v19  ;;  %v4040_v19 = vld [vmem:[%s5336_s15 + $0x34] ss:$8 sps:$4 sm:$0xff]   ;;  %v4077_v17 = vld [vmem:[%s5337_s16] ss:$8 sps:$4 sm:$0xff]  }
 0x3b6   : > { %3903 = vmatprep.mubr.msk.bf16.mxu1 %vm4213_vm9, %v5387_v33  ;;  %3896 = vmatpush3.bf16.msra.mxu1 %v4022_v50  ;;  %v4041_v50 = vld [vmem:[%s5336_s15 + $0x20] ss:$8 sps:$4 sm:$0xff]  }
 0x3b7   : > { %3897 = vmatprep.subr.bf16.mxu1 %v5387_v33  ;;  %2969 = vmatprep.subr.bf16.mxu0 %v4040_v19  ;;  %v4121_v19 = vld [vmem:[%s5336_s15 + $0x114] ss:$8 sps:$4 sm:$0xff]  }
 0x3b8   : > { %2970 = vmatpush1.bf16.msra.mxu0 %v4038_v18  ;;  %v4124_v18 = vld [vmem:[%s5336_s15 + $0x224] ss:$8 sps:$4 sm:$0xff]  }
 0x3b9   : > { %2971 = vmatprep.subr.bf16.mxu0 %v4043_v11  ;;  %v4127_v11 = vld [vmem:[%s5336_s15 + $0x104] ss:$8 sps:$4 sm:$0xff]  }
 0x3ba   : > { %3898 = vmatpush3.bf16.msra.mxu1 %v4023_v47  ;;  %v4046_v47 = vld [vmem:[%s5336_s15 + $0x14] ss:$8 sps:$4 sm:$0xff]  }
 0x3bb   : > { %3899 = vmatprep.subr.bf16.mxu1 %v5387_v33 }
 0x3bc   : > { %2972 = vmatpush1.bf16.msra.mxu0 %v4041_v50  ;;  %v4130_v50 = vld [vmem:[%s5336_s15 + $0x214] ss:$8 sps:$4 sm:$0xff]  }
 0x3bd   : > { %2973 = vmatprep.subr.bf16.mxu0 %v4046_v47  ;;  %v4125_v47 = vld [vmem:[%s5336_s15 + $0x100] ss:$8 sps:$4 sm:$0xff]  }
 0x3be   : > { %3900 = vmatpush3.bf16.msra.mxu1 %v4024_v13  ;;  %v4049_v13 = vld [vmem:[%s5336_s15 + $0x4] ss:$8 sps:$4 sm:$0xff]  }
 0x3bf   : > { %3901 = vmatprep.subr.bf16.mxu1 %v5387_v33 }
 0x3c2   : > { %3902 = vmatpush3.bf16.msra.mxu1 %v4025_v22  ;;  %v4052_v22 = vld [vmem:[%s5336_s15 + $0xf4] ss:$8 sps:$4 sm:$0xff]  }
 0x3c3   : > { %2528 = vmatprep.subr.bf16.mxu1 %v4061_v57  ;;  %v4104_v57 = vld [vmem:[%s5336_s15 + $0x250] ss:$8 sps:$4 sm:$0xff]  }
 0x3ce   : > { %v2258_v44 = vpop.f32.mrf.mxu0 }
 0x3d0   : > { %v3893_v9 = vpop.f32.mrf.mxu0 }
 0x3d1   : > { %v4047_v9 = vld [vmem:[%s5336_s15] ss:$8 sps:$4 sm:$0xff]  }
 0x3d2   : > { %v2261_v38 = vpop.f32.mrf.mxu0 }
 0x3d3   : > { %v4050_v38 = vld [vmem:[%s5336_s15 + $0xf0] ss:$8 sps:$4 sm:$0xff]  }
 0x3d4   : > { %v3894_v32 = vpop.f32.mrf.mxu0 }
 0x3d5   : > { %v4055_v32 = vld [vmem:[%s5336_s15 + $0xe4] ss:$8 sps:$4 sm:$0xff]  }
 0x455   : > { %v1898_v35 = vpop.f32.mrf.mxu1 }
 0x456   : > { %v2179_v46 = vadd.f32 %v3744_v37, %v1898_v35  ;;  %v4079_v37 = vld [vmem:[%s5337_s16 + $0x4] ss:$8 sps:$4 sm:$0xff]   ;;  %v4053_v35 = vld [vmem:[%s5336_s15 + $0xe0] ss:$8 sps:$4 sm:$0xff]  }
 0x457   : > { %v3873_v40 = vpop.f32.mrf.mxu1 }
 0x458   : > { %v4058_v40 = vld [vmem:[%s5336_s15 + $0xd4] ss:$8 sps:$4 sm:$0xff]  }
 0x459   : > { %v1901_v30 = vpop.f32.mrf.mxu1 }
 0x45a   : > { %v4056_v30 = vld [vmem:[%s5336_s15 + $0xd0] ss:$8 sps:$4 sm:$0xff]  }
 0x45b   : > { %v3874_v60 = vpop.f32.mrf.mxu1 }
 0x45c   : > { %v4064_v60 = vld [vmem:[%s5336_s15 + $0xc4] ss:$8 sps:$4 sm:$0xff]  }
 0x475   : > { %v3764_v6 = vpop.f32.mrf.mxu1 }
 0x477   : > { %v3765_v55 = vpop.f32.mrf.mxu1 }
 0x478   : > { %v3766_v23 = vadd.f32 %v3765_v55, %v3764_v6  ;;  %v4062_v6 = vld [vmem:[%s5336_s15 + $0xc0] ss:$8 sps:$4 sm:$0xff]   ;;  %v4070_v55 = vld [vmem:[%s5336_s15 + $0xb4] ss:$8 sps:$4 sm:$0xff]  }
 0x479   : > { %v3767_v42 = vpop.f32.mrf.mxu1 }
 0x47a   : > { %v2219_v16 = vadd.f32 %v3766_v23, %v2179_v46  ;;  %v4068_v46 = vld [vmem:[%s5336_s15 + $0xb0] ss:$8 sps:$4 sm:$0xff]   ;;  %v4076_v23 = vld [vmem:[%s5336_s15 + $0xa4] ss:$8 sps:$4 sm:$0xff]   ;;  %v4074_v42 = vld [vmem:[%s5336_s15 + $0xa0] ss:$8 sps:$4 sm:$0xff]  }
 0x47b   : > { %v3768_v28 = vpop.f32.mrf.mxu1 }
 0x47c   : > { %v2259_v0 = vadd.f32 %v2258_v44, %v2219_v16  ;;  %v4044_v44 = vld [vmem:[%s5336_s15 + $0x10] ss:$8 sps:$4 sm:$0xff]  }
 0x47d   : > { %2974 = vmatpush1.bf16.msra.mxu0 %v4044_v44  ;;  %v4133_v44 = vld [vmem:[%s5336_s15 + $0x1f4] ss:$8 sps:$4 sm:$0xff]  }
 0x47e   : > { %v2271_v15 = vadd.f32 %v3575_v62, %v2259_v0  ;;  %2975 = vmatprep.subr.bf16.mxu0 %v4049_v13  ;;  %v4080_v0 = vld [vmem:[%s5336_s15 + $0x90] ss:$8 sps:$4 sm:$0xff]  }
 0x47f   : > { %v4128_v13 = vld [vmem:[%s5336_s15 + $0x210] ss:$8 sps:$4 sm:$0xff]  }
 0x480   : > { %v2272_v5 = vmax.f32 %v2271_v15, 0.0  ;;  %v4082_v15 = vld [vmem:[%s5336_s15 + $0x94] ss:$8 sps:$4 sm:$0xff]  }
 0x481   : > { %2976 = vmatpush1.bf16.msra.mxu0 %v4047_v9  ;;  %v4136_v9 = vld [vmem:[%s5336_s15 + $0x204] ss:$8 sps:$4 sm:$0xff]  }
 0x482   : > { %v2273_v34 = vpack.c.bf16 %v2272_v5, %v2272_v5  ;;  %2977 = vmatprep.subr.bf16.mxu0 %v4052_v22  ;;  %v4085_v5 = vld [vmem:[%s5336_s15 + $0x174] ss:$8 sps:$4 sm:$0xff]   ;;  %v4131_v22 = vld [vmem:[%s5336_s15 + $0x1f0] ss:$8 sps:$4 sm:$0xff]  }
 0x484   : > { %3904 = vmatmul.mubr.msk.bf16.vlgmr.msra.gmra.mxu1 %vm1466_vm8, %v2273_v34  ;;  %v4086_v34 = vld [vmem:[%s5336_s15 + $0x80] ss:$8 sps:$4 sm:$0xff]  }
 0x485   : > { %2552 = vmatprep.mubr.bf16.mxu1 %v5390_v25  ;;  %2529 = vmatpush1.bf16.msra.mxu1 %v4059_v7  ;;  %v4109_v7 = vld [vmem:[%s5336_s15 + $0x134] ss:$8 sps:$4 sm:$0xff]  }
 0x486   : > { %2530 = vmatprep.subr.bf16.mxu1 %v4067_v58  ;;  %2978 = vmatpush2.bf16.msra.mxu0 %v4050_v38  ;;  %v4115_v58 = vld [vmem:[%s5336_s15 + $0x124] ss:$8 sps:$4 sm:$0xff]  }
 0x487   : > { %2979 = vmatprep.subr.bf16.mxu0 %v4055_v32  ;;  %v4139_v38 = vld [vmem:[%s5336_s15 + $0x1e4] ss:$8 sps:$4 sm:$0xff]   ;;  %v4134_v32 = vld [vmem:[%s5336_s15 + $0x200] ss:$8 sps:$4 sm:$0xff]  }
 0x489   : > { %2531 = vmatpush1.bf16.msra.mxu1 %v4065_v2  ;;  %v4110_v2 = vld [vmem:[%s5336_s15 + $0x240] ss:$8 sps:$4 sm:$0xff]  }
 0x48a   : > { %2532 = vmatprep.subr.bf16.mxu1 %v4073_v54  ;;  %2980 = vmatpush2.bf16.msra.mxu0 %v4053_v35  ;;  %v4113_v54 = vld [vmem:[%s5336_s15 + $0x120] ss:$8 sps:$4 sm:$0xff]  }
 0x48b   : > { %2981 = vmatprep.subr.bf16.mxu0 %v4058_v40  ;;  %v4137_v40 = vld [vmem:[%s5336_s15 + $0x1e0] ss:$8 sps:$4 sm:$0xff]  }
 0x48d   : > { %2533 = vmatpush1.bf16.msra.mxu1 %v4071_v10  ;;  %v4116_v10 = vld [vmem:[%s5336_s15 + $0x230] ss:$8 sps:$4 sm:$0xff]  }
 0x48e   : > { %2534 = vmatprep.subr.bf16.mxu1 %v4079_v37  ;;  %2982 = vmatpush2.bf16.msra.mxu0 %v4056_v30  ;;  %v4119_v37 = vld [vmem:[%s5336_s15 + $0x110] ss:$8 sps:$4 sm:$0xff]   ;;  %v4142_v30 = vld [vmem:[%s5336_s15 + $0x1d4] ss:$8 sps:$4 sm:$0xff]  }
 0x48f   : > { %2983 = vmatprep.subr.bf16.mxu0 %v4064_v60 }
 0x491   : > { %2535 = vmatpush1.bf16.msra.mxu1 %v4077_v17  ;;  %v4122_v17 = vld [vmem:[%s5336_s15 + $0x220] ss:$8 sps:$4 sm:$0xff]  }
 0x492   : > { %2984 = vmatpush2.bf16.msra.mxu0 %v4062_v6  ;;  %3002 = vmatprep.subr.bf16.mxu1 %v4085_v5  ;;  %v4140_v6 = vld [vmem:[%s5336_s15 + $0x1d0] ss:$8 sps:$4 sm:$0xff]  }
 0x493   : > { %2985 = vmatprep.subr.bf16.mxu0 %v4070_v55  ;;  %v4143_v55 = vld [vmem:[%s5336_s15 + $0x1c0] ss:$8 sps:$4 sm:$0xff]  }
 0x496   : > { %2986 = vmatpush2.bf16.msra.mxu0 %v4068_v46  ;;  %v4148_v46 = vld [vmem:[%s5336_s15 + $0x1b4] ss:$8 sps:$4 sm:$0xff]  }
 0x497   : > { %2987 = vmatprep.subr.bf16.mxu0 %v4076_v23  ;;  %v4146_v23 = vld [vmem:[%s5336_s15 + $0x1b0] ss:$8 sps:$4 sm:$0xff]  }
 0x49a   : > { %2988 = vmatpush2.bf16.msra.mxu0 %v4074_v42  ;;  %v4151_v42 = vld [vmem:[%s5336_s15 + $0x1a4] ss:$8 sps:$4 sm:$0xff]  }
 0x49b   : > { %2989 = vmatprep.subr.bf16.mxu0 %v4082_v15  ;;  %v4155_v15 = vld [vmem:[%s5336_s15 + $0x180] ss:$8 sps:$4 sm:$0xff]  }
 0x49e   : > { %2990 = vmatpush2.bf16.msra.mxu0 %v4080_v0  ;;  %v4157_v0 = vld [vmem:[%s5336_s15 + $0x184] ss:$8 sps:$4 sm:$0xff]  }
 0x544   : > { %v2350_v21 = vpop.f32.mrf.mxu1 }
 0x545   : > { %v2351_v36 = vadd.f32 %v3576_v56, %v2350_v21  ;;  %v4088_v56 = vld [vmem:[%s5336_s15 + $0x84] ss:$8 sps:$4 sm:$0xff]   ;;  %v4094_v21 = vld [vmem:[%s5336_s15 + $0x274] ss:$8 sps:$4 sm:$0xff]  }
 0x546   : > { %v3905_v39 = vpop.f32.mrf.mxu1  ;;  %2991 = vmatprep.subr.bf16.mxu0 %v4088_v56  ;;  %v4158_v56 = vld [vmem:[%s5339_s18 + $0x78] sm:$0xff]  }
 0x547   : > { %v2357_v31 = vsel %vm2356_vm12, %v2351_v36, -inf  ;;  %2992 = vmatpush2.bf16.msra.mxu0 %v4086_v34 }
 0x548   : > { %2358 = vmax.xlane.f32.xlu0 %v2357_v31  ;;  %v2353_v48 = vpop.f32.mrf.mxu1  ;;  %3043 = vmatprep.subr.bf16.mxu0 %v4094_v21  ;;  %v4083_v31 = vld [vmem:[%s5336_s15 + $0x170] ss:$8 sps:$4 sm:$0xff]  }
 0x549   : > { %v4159_v21 = vld [vmem:[%s5339_s18 + $0x38] sm:$0xff]  }
 0x54a   : > { %v3906_v4 = vpop.f32.mrf.mxu1 }
 0x54b   : > { %v4091_v4 = vld [vmem:[%s5336_s15 + $0x164] ss:$8 sps:$4 sm:$0xff]  }
 0x5d1   : > { %v2359_v24 = vpop.xlane.xlu0 %2358 }
 0x5d2   : > { %v2360_v12 = vsub.f32 %v2351_v36, %v2359_v24 }
 0x5d4   : > { %v2361_v59 = vmul.f32 1.442695, %v2360_v12  ;;  %v4089_v12 = vld [vmem:[%s5336_s15 + $0x160] ss:$8 sps:$4 sm:$0xff]  }
 0x5d6   : > { %4182 = vpow2.f32 %v2361_v59 }
 0x5e3   : > { %v4920_v20 = vpop.eup %4182 }
 0x5e4   : > { %v2363_v45 = vsel %vm2356_vm12, %v4920_v20, 0.0 }
 0x5e5   : > { %2364 = vadd.xlane.f32.xlu0 %v2363_v45 }
 0x66e   : > { %v2365_v16 = vpop.xlane.xlu0 %2364 }
 0x66f   : > { %4184 = vrcp.f32 %v2365_v16  ;;  %v4149_v16 = vld [vmem:[%s5336_s15 + $0x1a0] ss:$8 sps:$4 sm:$0xff]  }
 0x67c   : > { %v4185_v28 = vpop.eup %4184 }
 0x67d   : > { %v2367_v62 = vmul.f32 %v4185_v28, %v4920_v20  ;;  %v4154_v28 = vld [vmem:[%s5336_s15 + $0x194] ss:$8 sps:$4 sm:$0xff]  }
 0x67f   : > { %2384 = vperm.xlu1 %3960, %v2367_v62  }
 0x683   : > { %3961 = vset.pattern.permute.xlu1 %v5390_v25 }
 0x684   : > { %2370 = vperm.xlu1 %3961, %v2367_v62   ;;  %v4152_v62 = vld [vmem:[%s5336_s15 + $0x190] ss:$8 sps:$4 sm:$0xff]  }
 0x6fa   : > { %v5051_v36 = vpop.permute.xlu1 %2384 }
 0x6fb   : > { %v2387_v39 = vmul.f32 %v5051_v36, %v4837_v14 }
 0x6fd   : > { %v2388_v48 = vpack.c.bf16 %v2387_v39, %v2387_v39  ;;  %v4160_v39 = vld [vmem:[%s5339_s18 + $0x70] sm:$0xff]  }
 0x6ff   : > { %3590 = vmatmul.mubr.msk.bf16.vlgmr.msra.gmra.mxu1 %vm1466_vm8, %v2388_v48  ;;  %v5062_v24 = vpop.permute.xlu1 %2370  ;;  %v4163_v48 = vld [vmem:[%s5339_s18 + $0x28] sm:$0xff]  }
 0x700   : > { %3003 = vmatpush1.bf16.msra.mxu1 %v4083_v31  ;;  %v2374_v14 = vmul.f32 %v5062_v24, %v4779_v27  ;;  %v2376_v59 = vmul.f32 %v5062_v24, %v4835_v43  ;;  %v2373_v20 = vmul.f32 %v5062_v24, %v4786_v1  ;;  %v4100_v27 = vld [vmem:[%s5336_s15 + $0x264] ss:$8 sps:$4 sm:$0xff]   ;;  %v4095_v1 = vld [vmem:[%s5336_s15 + $0x150] ss:$8 sps:$4 sm:$0xff]   ;;  %v2377_v35 = vmul.f32 %v5062_v24, %v4823_v51 }
 0x701   : > { %3004 = vmatprep.subr.bf16.mxu1 %v4091_v4  ;;  %v4103_v43 = vld [vmem:[%s5336_s15 + $0x144] ss:$8 sps:$4 sm:$0xff]   ;;  %v2375_v5 = vmul.f32 %v5062_v24, %v4890_v61  ;;  %v4161_v61 = vld [vmem:[%s5339_s18 + $0x30] sm:$0xff]  }
 0x702   : > { %v2379_v45 = vpack.c.bf16 %v2374_v14, %v2374_v14  ;;  %v2381_v8 = vpack.c.bf16 %v2376_v59, %v2376_v59  ;;  %v2378_v63 = vpack.c.bf16 %v2373_v20, %v2373_v20  ;;  %v2382_v60 = vpack.c.bf16 %v2377_v35, %v2377_v35  ;;  %v4145_v51 = vld [vmem:[%s5336_s15 + $0x1c4] ss:$8 sps:$4 sm:$0xff]   ;;  %v4166_v14 = vld [vmem:[%s5339_s18 + $0x58] sm:$0xff]   ;;  %v4168_v20 = vld [vmem:[%s5339_s18 + $0x50] sm:$0xff]  }
 0x703   : > { %v2380_v34 = vpack.c.bf16 %v2375_v5, %v2375_v5  ;;  %v4162_v31 = vld [vmem:[%s5339_s18 + $0x68] sm:$0xff]   ;;  %v4164_v4 = vld [vmem:[%s5339_s18 + $0x60] sm:$0xff]   ;;  %v4167_v59 = vld [vmem:[%s5339_s18 + $0x18] sm:$0xff]  }
 0x704   : > { %3005 = vmatpush1.bf16.msra.mxu1 %v4089_v12  ;;  %2993 = vmatprep.mubr.bf16.mxu0 %v2379_v45  ;;  %v4165_v12 = vld [vmem:[%s5339_s18 + $0x20] sm:$0xff]   ;;  %v4169_v45 = vld [vmem:[%s5339_s18 + $0x10] sm:$0xff]  }
 0x705   : > { %3034 = vmatprep.mubr.bf16.mxu1 %v2381_v8  ;;  %2994 = vmatmul.mubr.bf16.vlgmr.msra.gmra.mxu0 %v2378_v63  ;;  %v4170_v8 = vld [vmem:[%s5339_s18 + $0x48] sm:$0xff]   ;;  %v4172_v63 = vld [vmem:[%s5339_s18 + $0x40] sm:$0xff]  }
 0x706   : > { %3044 = vmatpush1.bf16.msra.mxu0 %v4092_v49  ;;  %3006 = vmatprep.subr.bf16.mxu1 %v4097_v26  ;;  %v4171_v49 = vld [vmem:[%s5339_s18 + $0x8] sm:$0xff]   ;;  %v4174_v26 = vld [vmem:[%s5341_s20 + $0x38] sm:$0xff]  }
 0x707   : > { %3045 = vmatprep.subr.bf16.mxu0 %v4100_v27  ;;  %3075 = vmatprep.mubr.bf16.mxu0 %v5390_v25  ;;  %v4112_v25 = vld [vmem:[%s5336_s15 + $0x244] ss:$8 sps:$4 sm:$0xff]  }
 0x708   : > { %3007 = vmatpush1.bf16.msra.mxu1 %v4095_v1  ;;  %v4173_v27 = vld [vmem:[%s5339_s18] sm:$0xff]   ;;  %v4175_v1 = vld [vmem:[%s5341_s20 + $0x30] sm:$0xff]  }
 0x709   : > { %3008 = vmatprep.subr.bf16.mxu1 %v4103_v43  ;;  %v4176_v43 = vld [vmem:[%s5341_s20 + $0x28] sm:$0xff]  }
 0x70a   : > { %3046 = vmatpush1.bf16.msra.mxu0 %v4098_v29  ;;  %v4177_v29 = vld [vmem:[%s5341_s20 + $0x20] sm:$0xff]  }
 0x70b   : > { %3047 = vmatprep.subr.bf16.mxu0 %v4106_v53  ;;  %v4178_v53 = vld [vmem:[%s5341_s20 + $0x18] sm:$0xff]  }
 0x70c   : > { %3009 = vmatpush1.bf16.msra.mxu1 %v4101_v41 }
 0x70d   : > { %3010 = vmatprep.subr.bf16.mxu1 %v4109_v7 }
 0x70e   : > { %3048 = vmatpush1.bf16.msra.mxu0 %v4104_v57 }
 0x70f   : > { %3049 = vmatprep.subr.bf16.mxu0 %v4112_v25 }
 0x710   : > { %3011 = vmatpush1.bf16.msra.mxu1 %v4107_v3 }
 0x711   : > { %3012 = vmatprep.subr.bf16.mxu1 %v4115_v58 }
 0x712   : > { %3050 = vmatpush1.bf16.msra.mxu0 %v4110_v2 }
 0x713   : > { %3051 = vmatprep.subr.bf16.mxu0 %v4118_v52 }
 0x714   : > { %3013 = vmatpush1.bf16.msra.mxu1 %v4113_v54 }
 0x715   : > { %3014 = vmatprep.subr.bf16.mxu1 %v4121_v19 }
 0x716   : > { %3052 = vmatpush1.bf16.msra.mxu0 %v4116_v10 }
 0x717   : > { %3053 = vmatprep.subr.bf16.mxu0 %v4124_v18 }
 0x718   : > { %3015 = vmatpush1.bf16.msra.mxu1 %v4119_v37  ;;  %v3084_v37 = vld [vmem:[%s5338_s17] sm:$0x3] }
 0x719   : > { %3016 = vmatprep.subr.bf16.mxu1 %v4127_v11 }
 0x71a   : > { %3054 = vmatpush1.bf16.msra.mxu0 %v4122_v17 }
 0x71b   : > { %3055 = vmatprep.subr.bf16.mxu0 %v4130_v50 }
 0x71c   : > { %3017 = vmatpush1.bf16.msra.mxu1 %v4125_v47 }
 0x71d   : > { %3018 = vmatprep.subr.bf16.mxu1 %v4133_v44  ;;  %v5391_v44 = vld [vmem:[#allocation3_spill] sm:$0xff] }
 0x71e   : > { %3056 = vmatpush1.bf16.msra.mxu0 %v4128_v13  ;;  %v3089_v13 = vrot.slane %v3084_v37, %v5391_v44 }
 0x71f   : > { %3057 = vmatprep.subr.bf16.mxu0 %v4136_v9 }
 0x720   : > { %3019 = vmatpush2.bf16.msra.mxu1 %v4131_v22 }
 0x721   : > { %3020 = vmatprep.subr.bf16.mxu1 %v4139_v38 }
 0x722   : > { %3058 = vmatpush1.bf16.msra.mxu0 %v4134_v32  ;;  %v5392_v32 = vld [vmem:[#allocation4_spill] sm:$0xff] }
 0x723   : > { %3907 = vmatprep.subr.bf16.mxu0 %v5387_v33  ;;  %v3093_v35 = vrot.slane %v3084_v37, %v5392_v32 }
 0x724   : > { %3021 = vmatpush2.bf16.msra.mxu1 %v4137_v40 }
 0x725   : > { %3076 = vmatmul.mubr.bf16.vlgmr.msra.gmra.mxu0 %v2382_v60  ;;  %3022 = vmatprep.subr.bf16.mxu1 %v4142_v30 }
 0x726   : > { %3923 = vmatprep.mubr.msk.bf16.mxu0 %vm4213_vm9, %v5387_v33  ;;  %3908 = vmatpush3.bf16.msra.mxu0 %v4174_v26 }
 0x727   : > { %3909 = vmatprep.subr.bf16.mxu0 %v5387_v33 }
 0x728   : > { %3023 = vmatpush2.bf16.msra.mxu1 %v4140_v6 }
 0x729   : > { %3024 = vmatprep.subr.bf16.mxu1 %v4145_v51 }
 0x72a   : > { %3910 = vmatpush3.bf16.msra.mxu0 %v4175_v1 }
 0x72b   : > { %3911 = vmatprep.subr.bf16.mxu0 %v5387_v33 }
 0x72c   : > { %3025 = vmatpush2.bf16.msra.mxu1 %v4143_v55 }
 0x72d   : > { %3026 = vmatprep.subr.bf16.mxu1 %v4148_v46 }
 0x72e   : > { %3912 = vmatpush3.bf16.msra.mxu0 %v4176_v43 }
 0x72f   : > { %3913 = vmatprep.subr.bf16.mxu0 %v5387_v33 }
 0x730   : > { %3027 = vmatpush2.bf16.msra.mxu1 %v4146_v23 }
 0x731   : > { %3028 = vmatprep.subr.bf16.mxu1 %v4151_v42 }
 0x732   : > { %3914 = vmatpush3.bf16.msra.mxu0 %v4177_v29 }
 0x733   : > { %3915 = vmatprep.subr.bf16.mxu0 %v5387_v33 }
 0x734   : > { %3029 = vmatpush2.bf16.msra.mxu1 %v4149_v16  ;;  %v4179_v16 = vld [vmem:[%s5341_s20 + $0x10] sm:$0xff]  }
 0x735   : > { %3030 = vmatprep.subr.bf16.mxu1 %v4154_v28  ;;  %v4180_v28 = vld [vmem:[%s5341_s20 + $0x8] sm:$0xff]  }
 0x736   : > { %3916 = vmatpush3.bf16.msra.mxu0 %v4178_v53 }
 0x737   : > { %3917 = vmatprep.subr.bf16.mxu0 %v5387_v33 }
 0x738   : > { %3031 = vmatpush2.bf16.msra.mxu1 %v4152_v62  ;;  %v4181_v62 = vld [vmem:[%s5341_s20] sm:$0xff]  }
 0x739   : > { %3032 = vmatprep.subr.bf16.mxu1 %v4157_v0 }
 0x73a   : > { %3918 = vmatpush3.bf16.msra.mxu0 %v4179_v16 }
 0x73b   : > { %3919 = vmatprep.subr.bf16.mxu0 %v5387_v33 }
 0x73c   : > { %3033 = vmatpush2.bf16.msra.mxu1 %v4155_v15  ;;  %v3671_v15 = vld [vmem:[%s5340_s19] ss:$0 sm:$0xff] }
 0x73d   : > { %3784 = vmatprep.subr.bf16.mxu1 %v4158_v56 }
 0x73e   : > { %3920 = vmatpush3.bf16.msra.mxu0 %v4180_v28 }
 0x73f   : > { %3035 = vmatmul.mubr.bf16.vlgmr.msra.gmra.mxu1 %v2380_v34  ;;  %3921 = vmatprep.subr.bf16.mxu0 %v5387_v33 }
 0x740   : > { %3785 = vmatpush3.bf16.msra.mxu1 %v4159_v21 }
 0x741   : > { %3786 = vmatprep.subr.bf16.mxu1 %v4160_v39 }
 0x742   : > { %3922 = vmatpush3.bf16.msra.mxu0 %v4181_v62 }
 0x744   : > { %3787 = vmatpush3.bf16.msra.mxu1 %v4161_v61 }
 0x745   : > { %3788 = vmatprep.subr.bf16.mxu1 %v4162_v31 }
 0x748   : > { %3789 = vmatpush3.bf16.msra.mxu1 %v4163_v48  ;;  %v3390_v48 = vld [vmem:[%s5343_s22] sm:$0x3] }
 0x749   : > { %3790 = vmatprep.subr.bf16.mxu1 %v4164_v4  ;;  %v3394_v33 = vrot.slane %v3390_v48, %v5391_v44  ;;  %v3688_v4 = vld [vmem:[%s5342_s21] ss:$0 sm:$0xff] }
 0x74c   : > { %3791 = vmatpush3.bf16.msra.mxu1 %v4165_v12  ;;  %v3400_v12 = vrot.slane %v3390_v48, %v5392_v32 }
 0x74d   : > { %3792 = vmatprep.subr.bf16.mxu1 %v4166_v14 }
 0x750   : > { %3793 = vmatpush3.bf16.msra.mxu1 %v4167_v59 }
 0x751   : > { %3794 = vmatprep.subr.bf16.mxu1 %v4168_v20  ;;  %v3395_v20 = vmul.f32 %v3394_v33, %v5062_v24 }
 0x754   : > { %3795 = vmatpush3.bf16.msra.mxu1 %v4169_v45 }
 0x755   : > { %3796 = vmatprep.subr.bf16.mxu1 %v4170_v8  ;;  %v3401_v8 = vmul.f32 %v3400_v12, %v5051_v36 }
 0x758   : > { %3797 = vmatpush3.bf16.msra.mxu1 %v4171_v49 }
 0x759   : > { %3798 = vmatprep.subr.bf16.mxu1 %v4172_v63 }
 0x75c   : > { %3799 = vmatpush3.bf16.msra.mxu1 %v4173_v27 }
 0x7bf   : > { %v2554_v41 = vpop.f32.mrf.mxu1 }
 0x7c1   : > { %v2556_v7 = vpop.f32.mrf.mxu1 }
 0x7c3   : > { %v2558_v57 = vpop.f32.mrf.mxu1 }
 0x7c5   : > { %v2559_v25 = vpop.f32.mrf.mxu1  ;;  %v2995_v3 = vpop.f32.mrf.mxu0 }
 0x7c6   : > { %v2996_v11 = vadd.f32 %v2995_v3, %v2554_v41 }
 0x7c7   : > { %v2997_v58 = vpop.f32.mrf.mxu0 }
 0x7c8   : > { %v2998_v50 = vadd.f32 %v2997_v58, %v2556_v7 }
 0x7c9   : > { %v2999_v2 = vpop.f32.mrf.mxu0 }
 0x7cb   : > { %v3000_v52 = vpop.f32.mrf.mxu0 }
 0x7e5   : > { %v3077_v54 = vpop.f32.mrf.mxu0 }
 0x7e7   : > { %v3079_v19 = vpop.f32.mrf.mxu0 }
 0x7e9   : > { %v3081_v10 = vpop.f32.mrf.mxu0 }
 0x7eb   : > { %v3082_v18 = vpop.f32.mrf.mxu0 }
 0x7ff   : > { %v3036_v17 = vpop.f32.mrf.mxu1 }
 0x800   : > { %v3037_v47 = vadd.f32 %v3036_v17, %v2996_v11 }
 0x801   : > { %v3038_v9 = vpop.f32.mrf.mxu1 }
 0x802   : > { %v3078_v22 = vadd.f32 %v3077_v54, %v3037_v47  ;;  %v3039_v38 = vadd.f32 %v3038_v9, %v2998_v50 }
 0x803   : > { %v3040_v40 = vpop.f32.mrf.mxu1 }
 0x804   : > { %v3096_v30 = vadd.f32 %v3089_v13, %v3078_v22  ;;  %v3080_v60 = vadd.f32 %v3079_v19, %v3039_v38 }
 0x805   : > { %v3041_v6 = vpop.f32.mrf.mxu1 }
 0x806   : > { %v3097_v51 = vadd.f32 %v3093_v35, %v3080_v60  ;;  %v3098_v55 = vmax.f32 %v3096_v30, 0.0 }
 0x808   : > { %v3099_v46 = vmax.f32 %v3097_v51, 0.0  ;;  %v3100_v42 = vpack.c.bf16 %v3098_v55, %v3098_v55 }
 0x80a   : > { %v3101_v23 = vpack.c.bf16 %v3099_v46, %v3099_v46 }
 0x80c   : > { %3269 = vmatprep.mubr.bf16.mxu1 %v3101_v23 }
 0x80d   : > { %3270 = vmatmul.mubr.bf16.vlgmr.msra.gmra.mxu1 %v3100_v42 }
 0x8cd   : > { %v3800_v0 = vpop.f32.mrf.mxu1 }
 0x8cf   : > { %v3801_v5 = vpop.f32.mrf.mxu1 }
 0x8d0   : > { %v3802_v34 = vadd.f32 %v3801_v5, %v3800_v0 }
 0x8d1   : > { %v3803_v56 = vpop.f32.mrf.mxu1 }
 0x8d2   : > { %v3272_v21 = vadd.f32 %v3802_v34, %v3671_v15 }
 0x8d3   : > { %v3804_v39 = vpop.f32.mrf.mxu1 }
 0x8d4   : > { %v3277_v61 = vmax.f32 %v3272_v21, 0.0 }
 0x8d6   : > { %v3278_v31 = vpack.c.bf16 %v3277_v61, %v3277_v61 }
 0x8d8   : > { %3924 = vmatmul.mubr.bf16.vlgmr.msra.gmra.mxu0 %v3278_v31 }
 0x998   : > { %v3384_v14 = vpop.f32.mrf.mxu0 }
 0x999   : > { %v3385_v59 = vadd.f32 %v3688_v4, %v3384_v14 }
 0x99a   : > { %v3925_v45 = vpop.f32.mrf.mxu0 }
 0x99b   : > { %v3396_v49 = vadd.f32 %v3395_v20, %v3385_v59 }
 0x99c   : > { %v3387_v63 = vpop.f32.mrf.mxu0 }
 0x99d   : > { %v3402_v26 = vadd.f32 %v3401_v8, %v3396_v49 }
 0x99e   : > { %v3926_v27 = vpop.f32.mrf.mxu0 }
 0x99f   : > { %3403 = vst [vmem:[%s753_s28] sm:$0xff] %v3402_v26 }
 0x9a0 PF: > { %s33_s24 = sadd.s32 1, %s4208_s24   ;;  %s5394_s4 = smov %s4204_s30 }
 0x9a1   : > { %p30_p5 = scmp.ge.s32.totalorder %s33_s24, 4   ;;  %s5395_s30 = smov %s5397_s25 }
 0x9a3   :  { %32 = sbr.rel (!%p30_p5) target bundleno = 9 (0x9), region = 153 }

</bundles_post_ra>
